<compile_context>
chip_gen: v5e
topology: v5e:2x2
jax: 0.10.0
libtpu: 0.0.40
codegen_flags: <defaults>
</compile_context>

<pallas_src>
import functools
import math

import jax
import jax.numpy as jnp
from jax.experimental import pallas as pl
from jax.experimental.pallas import tpu as pltpu  # noqa: F401  (TPU backend)

# ----------------------- small synthetic CamemBERT config -----------------------
VOCAB = 64
HIDDEN = 32
HEADS = 2
HEAD_DIM = HIDDEN // HEADS
INTER = 64
LAYERS = 2
MAX_POS = 64
PAD_IDX = 1          # RoBERTa/CamemBERT padding_idx
EPS = 1e-5

# ------------- packed vector-parameter slab row layout (f32, INTER lanes) -------
ROWS_PER_LAYER = HEADS + 7
OFF_QB = 0                 # + head : per-head query bias (HEAD_DIM lanes)
OFF_AOB = HEADS            # effective attn-output bias (V-bias folded in)
OFF_ALN_G = HEADS + 1
OFF_ALN_B = HEADS + 2
OFF_IB = HEADS + 3
OFF_OB = HEADS + 4
OFF_FLN_G = HEADS + 5
OFF_FLN_B = HEADS + 6
ROW_POOL_B = 2 + LAYERS * ROWS_PER_LAYER
NVEC = ROW_POOL_B + 1


def _gelu(y):
    # tanh-approx GELU (EUP tanh).
    # TODO(synk): HF camembert uses erf-GELU; swap in lax.erf if bit-exactness vs
    # PyTorch is required.
    return 0.5 * y * (1.0 + jnp.tanh(0.7978845608028654 * (y + 0.044715 * y * y * y)))


# ================================ fused Pallas kernel ============================

def _camem_kernel(idx_ref, emb_ref, attn_w_ref, ffn_w_ref, pool_w_ref, vec_ref,
                  o_ref, *, batch, seq):
    """Whole CamemBERT forward (incl. embedding lookup) -> pooler output."""
    f32 = jnp.float32
    bf16 = jnp.bfloat16
    bs = batch * seq
    scale = 1.0 / math.sqrt(HEAD_DIM)

    def vrow(r, n):                       # (1, n) f32 parameter row (static slice)
        return vec_ref[r:r + 1, 0:n]

    def layernorm(x, rg, rb):
        mu = jnp.mean(x, axis=-1, keepdims=True)
        var = jnp.mean((x - mu) * (x - mu), axis=-1, keepdims=True)
        return (x - mu) * jax.lax.rsqrt(var + EPS) * vrow(rg, HIDDEN) + vrow(rb, HIDDEN)

    def aw(l, kind, hd):                  # (HIDDEN, HEAD_DIM) bf16 weight block
        return attn_w_ref[(l * 4 + kind) * HEADS + hd]

    # --- embeddings: two-hot (token, VOCAB+position) @ combined table, 1 MXU op ---
    tok = idx_ref[:, 0:1]
    pos = idx_ref[:, 1:2]                 # already offset by VOCAB on the host
    iota = jax.lax.broadcasted_iota(jnp.int32, (bs, VOCAB + MAX_POS), 1)
    twohot = (jnp.where(iota == tok, 1.0, 0.0)
              + jnp.where(iota == pos, 1.0, 0.0)).astype(bf16)
    h = jnp.dot(twohot, emb_ref[...], preferred_element_type=f32)      # (bs, H)
    h = layernorm(h, 0, 1)

    # --- encoder layers: statically unrolled ---
    for l in range(LAYERS):
        base = 2 + l * ROWS_PER_LAYER
        last = l == LAYERS - 1
        if last:
            # Only the <s>/CLS rows feed the pooler: restrict last-layer queries,
            # FFN and LayerNorms to those rows (attention / FFN rows are independent,
            # so the result is identical to computing all rows and selecting).
            h_q = jnp.concatenate(
                [h[b * seq:b * seq + 1, :] for b in range(batch)], axis=0)  # (B, H)
            nq = 1
        else:
            h_q = h
            nq = seq
        hq_bf = h_q.astype(bf16)
        hk_bf = h.astype(bf16)

        # per-head attention, batched over the batch dim (no lane slices/concats).
        # K-bias is dropped (softmax is row-shift invariant); V-bias was folded
        # into the effective output bias at pack time.
        attn = vrow(base + OFF_AOB, HIDDEN)
        for hd in range(HEADS):
            q = (jnp.dot(hq_bf, aw(l, 0, hd), preferred_element_type=f32)
                 + vrow(base + OFF_QB + hd, HEAD_DIM))                  # (B*nq, Dh)
            k = jnp.dot(hk_bf, aw(l, 1, hd), preferred_element_type=f32)
            v = jnp.dot(hk_bf, aw(l, 2, hd), preferred_element_type=f32)
            q3 = q.reshape(batch, nq, HEAD_DIM).astype(bf16)
            k3 = k.reshape(batch, seq, HEAD_DIM).astype(bf16)
            v3 = v.reshape(batch, seq, HEAD_DIM).astype(bf16)

            s = jnp.einsum("bqd,bkd->bqk", q3, k3,
                           preferred_element_type=f32) * scale         # (B, nq, S)
            # TODO(synk): no padding-token attention mask (toy inputs contain no PAD).
            m = jnp.max(s, axis=-1, keepdims=True)
            p = jnp.exp(s - m)
            p = p * pl.reciprocal(jnp.sum(p, axis=-1, keepdims=True), approx=True)

            ctx = jnp.einsum("bqk,bkd->bqd", p.astype(bf16), v3,
                             preferred_element_type=f32)                # (B, nq, Dh)
            ctx2 = ctx.reshape(batch * nq, HEAD_DIM).astype(bf16)
            # head output projection; block stored transposed (H, Dh) => ctx2 @ W^T
            attn = attn + jax.lax.dot_general(
                ctx2, aw(l, 3, hd), (((1,), (1,)), ((), ())),
                preferred_element_type=f32)                             # (B*nq, H)

        h2 = layernorm(attn + h_q, base + OFF_ALN_G, base + OFF_ALN_B)

        inter = _gelu(jnp.dot(h2.astype(bf16), ffn_w_ref[2 * l],
                              preferred_element_type=f32)
                      + vrow(base + OFF_IB, INTER))                     # (B*nq, I)
        ffn = jax.lax.dot_general(inter.astype(bf16), ffn_w_ref[2 * l + 1],
                                  (((1,), (1,)), ((), ())),
                                  preferred_element_type=f32) + vrow(base + OFF_OB, HIDDEN)
        h = layernorm(ffn + h2, base + OFF_FLN_G, base + OFF_FLN_B)

    # --- pooler: tanh(W_p @ h_cls + b_p) == camembert(x)[1] ---
    pooled = jnp.tanh(jnp.dot(h.astype(bf16), pool_w_ref[...],
                              preferred_element_type=f32)
                      + vrow(ROW_POOL_B, HIDDEN))
    o_ref[...] = pooled.astype(o_ref.dtype)


# ============================ parameter initialization ==========================

def init_params(key):
    ks = jax.random.split(key, 23)
    it = iter(range(23))

    def w(k, shape, s=0.02):
        return (s * jax.random.normal(k, shape)).astype(jnp.float32)

    H, I, L = HIDDEN, INTER, LAYERS
    return {
        "word_emb": w(ks[next(it)], (VOCAB, H)),
        "pos_emb": w(ks[next(it)], (MAX_POS, H)),
        "type_emb": w(ks[next(it)], (1, H)),
        "emb_ln_g": 1.0 + w(ks[next(it)], (1, H), 0.05),
        "emb_ln_b": w(ks[next(it)], (1, H), 0.05),
        "q_w": w(ks[next(it)], (L, H, H)), "q_b": w(ks[next(it)], (L, 1, H)),
        "k_w": w(ks[next(it)], (L, H, H)), "k_b": w(ks[next(it)], (L, 1, H)),
        "v_w": w(ks[next(it)], (L, H, H)), "v_b": w(ks[next(it)], (L, 1, H)),
        "ao_w": w(ks[next(it)], (L, H, H)), "ao_b": w(ks[next(it)], (L, 1, H)),
        "attn_ln_g": 1.0 + w(ks[next(it)], (L, 1, H), 0.05),
        "attn_ln_b": w(ks[next(it)], (L, 1, H), 0.05),
        "i_w": w(ks[next(it)], (L, H, I)), "i_b": w(ks[next(it)], (L, 1, I)),
        "o_w": w(ks[next(it)], (L, I, H)), "o_b": w(ks[next(it)], (L, 1, H)),
        "ffn_ln_g": 1.0 + w(ks[next(it)], (L, 1, H), 0.05),
        "ffn_ln_b": w(ks[next(it)], (L, 1, H), 0.05),
        "pool_w": w(ks[next(it)], (H, H)), "pool_b": w(ks[next(it)], (1, H)),
    }


def pack_params(p):
    """Fold & pack raw parameters into the 5 kernel weight slabs."""
    H, I, Dh, L = HIDDEN, INTER, HEAD_DIM, LAYERS

    # combined embedding table: word rows then (pos + type) rows -> 128 lanes of twohot
    emb_table = jnp.concatenate(
        [p["word_emb"], p["pos_emb"] + p["type_emb"]], axis=0).astype(jnp.bfloat16)

    # attention weights: per (layer, kind[q,k,v,out^T], head) a (H, Dh) block
    blocks = []
    for l in range(L):
        for name in ("q_w", "k_w", "v_w"):
            for hd in range(HEADS):
                blocks.append(p[name][l][:, hd * Dh:(hd + 1) * Dh])
        for hd in range(HEADS):
            blocks.append(p["ao_w"][l][hd * Dh:(hd + 1) * Dh, :].T)
    attn_w = jnp.stack(blocks, axis=0).astype(jnp.bfloat16)      # (L*4*HEADS, H, Dh)

    # FFN weights: [W_in, W_out^T] per layer, uniform trailing shape (H, I)
    ffn_blocks = []
    for l in range(L):
        ffn_blocks.append(p["i_w"][l])
        ffn_blocks.append(p["o_w"][l].T)
    ffn_w = jnp.stack(ffn_blocks, axis=0).astype(jnp.bfloat16)   # (2L, H, I)

    # all small vector params in one f32 slab, one row each, padded to I lanes
    def row(v):
        v = v.reshape(1, -1)
        return jnp.pad(v, ((0, 0), (0, I - v.shape[1])))

    rows = [row(p["emb_ln_g"]), row(p["emb_ln_b"])]
    for l in range(L):
        for hd in range(HEADS):
            rows.append(row(p["q_b"][l][:, hd * Dh:(hd + 1) * Dh]))
        # K-bias is a no-op under softmax; V-bias folds into the output bias.
        rows.append(row(p["ao_b"][l] + p["v_b"][l] @ p["ao_w"][l]))
        rows.append(row(p["attn_ln_g"][l]))
        rows.append(row(p["attn_ln_b"][l]))
        rows.append(row(p["i_b"][l]))
        rows.append(row(p["o_b"][l]))
        rows.append(row(p["ffn_ln_g"][l]))
        rows.append(row(p["ffn_ln_b"][l]))
    rows.append(row(p["pool_b"]))
    vec = jnp.concatenate(rows, axis=0).astype(jnp.float32)      # (NVEC, I)
    assert vec.shape[0] == NVEC, vec.shape

    return {"emb_table": emb_table, "attn_w": attn_w, "ffn_w": ffn_w,
            "pool_w": p["pool_w"].astype(jnp.bfloat16), "vec": vec}


# ================================== forward pass ================================

def camem_forward(packed, ids):
    """Equivalent of camemWRAP.forward: CamembertModel(ids)[1] (pooler output)."""
    B, S = ids.shape
    mask = (ids != PAD_IDX).astype(jnp.int32)
    pos_ids = jnp.cumsum(mask, axis=1) * mask + PAD_IDX          # RoBERTa position ids
    idx = jnp.stack([ids, VOCAB + pos_ids], axis=-1).reshape(B * S, 2).astype(jnp.int32)

    kernel = functools.partial(_camem_kernel, batch=B, seq=S)
    # grid=() single invocation: the whole encoder is VMEM-resident (~40 KB of
    # packed weights); HBM traffic is 6 input DMAs + one tiny (B, H) store.
    # TODO(synk): for non-toy sizes, add a batch grid axis ("parallel"; v7x has 2
    # TensorCores) and stream per-layer weight tiles instead of keeping all resident.
    return pl.pallas_call(
        kernel,
        out_shape=jax.ShapeDtypeStruct((B, HIDDEN), jnp.float32),
    )(idx, packed["emb_table"], packed["attn_w"], packed["ffn_w"],
      packed["pool_w"], packed["vec"])


# ============================ pure-JAX reference (check) ========================

def camem_reference(params, ids):
    B, S = ids.shape
    mask = (ids != PAD_IDX).astype(jnp.int32)
    pos_ids = jnp.cumsum(mask, axis=1) * mask + PAD_IDX
    emb = (jnp.take(params["word_emb"], ids, axis=0)
           + jnp.take(params["pos_emb"], pos_ids, axis=0)
           + params["type_emb"][0][None, None, :])
    h = emb.reshape(B * S, HIDDEN)

    def ln(x, g, b):
        mu = jnp.mean(x, -1, keepdims=True)
        var = jnp.mean((x - mu) ** 2, -1, keepdims=True)
        return (x - mu) * jax.lax.rsqrt(var + EPS) * g + b

    h = ln(h, params["emb_ln_g"], params["emb_ln_b"])
    for l in range(LAYERS):
        q = h @ params["q_w"][l] + params["q_b"][l]
        k = h @ params["k_w"][l] + params["k_b"][l]
        v = h @ params["v_w"][l] + params["v_b"][l]

        def heads(t):
            return t.reshape(B, S, HEADS, HEAD_DIM).transpose(0, 2, 1, 3)

        qh, kh, vh = heads(q), heads(k), heads(v)
        s = jnp.einsum("bhqd,bhkd->bhqk", qh, kh) / math.sqrt(HEAD_DIM)
        p = jax.nn.softmax(s, axis=-1)
        ctx = (jnp.einsum("bhqk,bhkd->bhqd", p, vh)
               .transpose(0, 2, 1, 3).reshape(B * S, HIDDEN))
        h = ln(ctx @ params["ao_w"][l] + params["ao_b"][l] + h,
               params["attn_ln_g"][l], params["attn_ln_b"][l])
        y = h @ params["i_w"][l] + params["i_b"][l]
        y = 0.5 * y * (1.0 + jnp.tanh(0.7978845608028654 * (y + 0.044715 * y ** 3)))
        h = ln(y @ params["o_w"][l] + params["o_b"][l] + h,
               params["ffn_ln_g"][l], params["ffn_ln_b"][l])
    cls = h.reshape(B, S, HIDDEN)[:, 0, :]
    return jnp.tanh(cls @ params["pool_w"] + params["pool_b"])


# ===================================== main =====================================

if __name__ == "__main__":
    key = jax.random.PRNGKey(0)
    pkey, dkey = jax.random.split(key)

    params = init_params(pkey)
    packed = pack_params(params)

    B, S = 2, 8
    # token ids (CamemBERT input): <s>=0 at position 0, rest random non-pad ids.
    ids = jax.random.randint(dkey, (B, S), 2, VOCAB).astype(jnp.int32)
    ids = ids.at[:, 0].set(0)

    fwd = jax.jit(camem_forward)
    pooled = fwd(packed, ids)
    jax.block_until_ready(pooled)

    assert pooled.shape == (B, HIDDEN), pooled.shape
    assert bool(jnp.all(jnp.isfinite(pooled)))

    # numerical check against plain-f32 JAX reference (loose: kernel uses bf16
    # matmul operands and EUP approx reciprocal in the softmax).
    ref = camem_reference(params, ids)
    err = float(jnp.max(jnp.abs(pooled - ref)))
    assert bool(jnp.allclose(pooled, ref, rtol=5e-2, atol=2e-2)), err

    print("KERNEL_OK")
</pallas_src>

<mosaic_0001>
module attributes {stable_mosaic.version = 11 : i64} {
  func.func @_camem_kernel(%arg0: memref<16x2xi32, #tpu.memory_space<vmem>>, %arg1: memref<128x32xbf16, #tpu.memory_space<vmem>>, %arg2: memref<16x32x16xbf16, #tpu.memory_space<vmem>>, %arg3: memref<4x32x64xbf16, #tpu.memory_space<vmem>>, %arg4: memref<32x32xbf16, #tpu.memory_space<vmem>>, %arg5: memref<21x64xf32, #tpu.memory_space<vmem>>, %arg6: memref<2x32xf32, #tpu.memory_space<vmem>>) attributes {dimension_semantics = [], scalar_prefetch = 0 : i64, scratch_operands = 0 : i64, tpu.core_type = #tpu.core_type<tc>} {
    %c0 = arith.constant 0 : index
    %c0_0 = arith.constant 0 : index
    %0 = vector.load %arg0[%c0, %c0_0] : memref<16x2xi32, #tpu.memory_space<vmem>>, vector<16x1xi32>
    %c0_1 = arith.constant 0 : index
    %c1 = arith.constant 1 : index
    %1 = vector.load %arg0[%c0_1, %c1] : memref<16x2xi32, #tpu.memory_space<vmem>>, vector<16x1xi32>
    %2 = tpu.iota {dimensions = array<i32: 1>} : vector<16x128xi32>
    %3 = vector.broadcast %0 : vector<16x1xi32> to vector<16x128xi32>
    %4 = arith.cmpi eq, %2, %3 : vector<16x128xi32>
    %cst = arith.constant 1.000000e+00 : f32
    %cst_2 = arith.constant 0.000000e+00 : f32
    %5 = vector.broadcast %cst : f32 to vector<16x128xf32>
    %6 = vector.broadcast %cst_2 : f32 to vector<16x128xf32>
    %7 = arith.select %4, %5, %6 : vector<16x128xi1>, vector<16x128xf32>
    %8 = vector.broadcast %1 : vector<16x1xi32> to vector<16x128xi32>
    %9 = arith.cmpi eq, %2, %8 : vector<16x128xi32>
    %cst_3 = arith.constant 1.000000e+00 : f32
    %cst_4 = arith.constant 0.000000e+00 : f32
    %10 = vector.broadcast %cst_3 : f32 to vector<16x128xf32>
    %11 = vector.broadcast %cst_4 : f32 to vector<16x128xf32>
    %12 = arith.select %9, %10, %11 : vector<16x128xi1>, vector<16x128xf32>
    %13 = arith.addf %7, %12 : vector<16x128xf32>
    %14 = arith.truncf %13 : vector<16x128xf32> to vector<16x128xbf16>
    %c0_5 = arith.constant 0 : index
    %c0_6 = arith.constant 0 : index
    %15 = vector.load %arg1[%c0_5, %c0_6] : memref<128x32xbf16, #tpu.memory_space<vmem>>, vector<128x32xbf16>
    %cst_7 = arith.constant dense<0.000000e+00> : vector<16x32xf32>
    %16 = tpu.matmul %14, %15, %cst_7 {dimension_numbers = #tpu.dot_dimension_numbers<[1], [0], [0], [1], [0, 0, 1, 1], [], []>} : vector<16x128xbf16>, vector<128x32xbf16>, vector<16x32xf32> -> vector<16x32xf32>
    %cst_8 = arith.constant dense<0.000000e+00> : vector<16xf32>
    %17 = vector.multi_reduction <add>, %16, %cst_8 [1] : vector<16x32xf32> to vector<16xf32>
    %18 = vector.shape_cast %17 : vector<16xf32> to vector<16x1xf32>
    %cst_9 = arith.constant 3.200000e+01 : f32
    %19 = vector.broadcast %cst_9 : f32 to vector<16x1xf32>
    %20 = arith.divf %18, %19 : vector<16x1xf32>
    %21 = vector.broadcast %20 : vector<16x1xf32> to vector<16x32xf32>
    %22 = arith.subf %16, %21 : vector<16x32xf32>
    %23 = vector.broadcast %20 : vector<16x1xf32> to vector<16x32xf32>
    %24 = arith.subf %16, %23 : vector<16x32xf32>
    %25 = arith.mulf %22, %24 : vector<16x32xf32>
    %cst_10 = arith.constant dense<0.000000e+00> : vector<16xf32>
    %26 = vector.multi_reduction <add>, %25, %cst_10 [1] : vector<16x32xf32> to vector<16xf32>
    %27 = vector.shape_cast %26 : vector<16xf32> to vector<16x1xf32>
    %cst_11 = arith.constant 3.200000e+01 : f32
    %28 = vector.broadcast %cst_11 : f32 to vector<16x1xf32>
    %29 = arith.divf %27, %28 : vector<16x1xf32>
    %30 = vector.broadcast %20 : vector<16x1xf32> to vector<16x32xf32>
    %31 = arith.subf %16, %30 : vector<16x32xf32>
    %cst_12 = arith.constant 9.99999974E-6 : f32
    %32 = vector.broadcast %cst_12 : f32 to vector<16x1xf32>
    %33 = arith.addf %29, %32 : vector<16x1xf32>
    %34 = math.rsqrt %33 : vector<16x1xf32>
    %35 = vector.broadcast %34 : vector<16x1xf32> to vector<16x32xf32>
    %36 = arith.mulf %31, %35 : vector<16x32xf32>
    %c0_13 = arith.constant 0 : index
    %c0_14 = arith.constant 0 : index
    %37 = vector.load %arg5[%c0_13, %c0_14] : memref<21x64xf32, #tpu.memory_space<vmem>>, vector<1x32xf32>
    %38 = vector.broadcast %37 : vector<1x32xf32> to vector<16x32xf32>
    %39 = arith.mulf %36, %38 : vector<16x32xf32>
    %c1_15 = arith.constant 1 : index
    %c0_16 = arith.constant 0 : index
    %40 = vector.load %arg5[%c1_15, %c0_16] : memref<21x64xf32, #tpu.memory_space<vmem>>, vector<1x32xf32>
    %41 = vector.broadcast %40 : vector<1x32xf32> to vector<16x32xf32>
    %42 = arith.addf %39, %41 : vector<16x32xf32>
    %43 = arith.truncf %42 : vector<16x32xf32> to vector<16x32xbf16>
    %44 = arith.truncf %42 : vector<16x32xf32> to vector<16x32xbf16>
    %c4 = arith.constant 4 : index
    %c0_17 = arith.constant 0 : index
    %45 = vector.load %arg5[%c4, %c0_17] : memref<21x64xf32, #tpu.memory_space<vmem>>, vector<1x32xf32>
    %c0_18 = arith.constant 0 : index
    %c0_19 = arith.constant 0 : index
    %c0_20 = arith.constant 0 : index
    %46 = vector.load %arg2[%c0_18, %c0_19, %c0_20] : memref<16x32x16xbf16, #tpu.memory_space<vmem>>, vector<1x32x16xbf16>
    %47 = vector.shape_cast %46 : vector<1x32x16xbf16> to vector<32x16xbf16>
    %cst_21 = arith.constant dense<0.000000e+00> : vector<16x16xf32>
    %48 = tpu.matmul %43, %47, %cst_21 {dimension_numbers = #tpu.dot_dimension_numbers<[1], [0], [0], [1], [0, 0, 1, 1], [], []>} : vector<16x32xbf16>, vector<32x16xbf16>, vector<16x16xf32> -> vector<16x16xf32>
    %c2 = arith.constant 2 : index
    %c0_22 = arith.constant 0 : index
    %49 = vector.load %arg5[%c2, %c0_22] : memref<21x64xf32, #tpu.memory_space<vmem>>, vector<1x16xf32>
    %50 = vector.broadcast %49 : vector<1x16xf32> to vector<16x16xf32>
    %51 = arith.addf %48, %50 : vector<16x16xf32>
    %c2_23 = arith.constant 2 : index
    %c0_24 = arith.constant 0 : index
    %c0_25 = arith.constant 0 : index
    %52 = vector.load %arg2[%c2_23, %c0_24, %c0_25] : memref<16x32x16xbf16, #tpu.memory_space<vmem>>, vector<1x32x16xbf16>
    %53 = vector.shape_cast %52 : vector<1x32x16xbf16> to vector<32x16xbf16>
    %cst_26 = arith.constant dense<0.000000e+00> : vector<16x16xf32>
    %54 = tpu.matmul %44, %53, %cst_26 {dimension_numbers = #tpu.dot_dimension_numbers<[1], [0], [0], [1], [0, 0, 1, 1], [], []>} : vector<16x32xbf16>, vector<32x16xbf16>, vector<16x16xf32> -> vector<16x16xf32>
    %c4_27 = arith.constant 4 : index
    %c0_28 = arith.constant 0 : index
    %c0_29 = arith.constant 0 : index
    %55 = vector.load %arg2[%c4_27, %c0_28, %c0_29] : memref<16x32x16xbf16, #tpu.memory_space<vmem>>, vector<1x32x16xbf16>
    %56 = vector.shape_cast %55 : vector<1x32x16xbf16> to vector<32x16xbf16>
    %cst_30 = arith.constant dense<0.000000e+00> : vector<16x16xf32>
    %57 = tpu.matmul %44, %56, %cst_30 {dimension_numbers = #tpu.dot_dimension_numbers<[1], [0], [0], [1], [0, 0, 1, 1], [], []>} : vector<16x32xbf16>, vector<32x16xbf16>, vector<16x16xf32> -> vector<16x16xf32>
    %58 = vector.shape_cast %51 : vector<16x16xf32> to vector<2x8x16xf32>
    %59 = arith.truncf %58 : vector<2x8x16xf32> to vector<2x8x16xbf16>
    %60 = vector.shape_cast %54 : vector<16x16xf32> to vector<2x8x16xf32>
    %61 = arith.truncf %60 : vector<2x8x16xf32> to vector<2x8x16xbf16>
    %62 = vector.shape_cast %57 : vector<16x16xf32> to vector<2x8x16xf32>
    %63 = arith.truncf %62 : vector<2x8x16xf32> to vector<2x8x16xbf16>
    "tpu.trace_start"() <{level = 10 : i32, message = "bqd,bkd->bqk"}> : () -> ()
    %cst_31 = arith.constant dense<0.000000e+00> : vector<2x8x8xf32>
    %64 = tpu.matmul %59, %61, %cst_31 {dimension_numbers = #tpu.dot_dimension_numbers<[2], [2], [1], [1], [0, 0, 0, 1, 1, 1], [0], [0]>} : vector<2x8x16xbf16>, vector<2x8x16xbf16>, vector<2x8x8xf32> -> vector<2x8x8xf32>
    "tpu.trace_stop"() : () -> ()
    %cst_32 = arith.constant 2.500000e-01 : f32
    %65 = vector.broadcast %cst_32 : f32 to vector<2x8x8xf32>
    %66 = arith.mulf %64, %65 : vector<2x8x8xf32>
    %cst_33 = arith.constant dense<0xFF800000> : vector<2x8xf32>
    %67 = vector.multi_reduction <maximumf>, %66, %cst_33 [2] : vector<2x8x8xf32> to vector<2x8xf32>
    %68 = vector.shape_cast %67 : vector<2x8xf32> to vector<2x8x1xf32>
    %69 = vector.broadcast %68 : vector<2x8x1xf32> to vector<2x8x8xf32>
    %70 = arith.subf %66, %69 : vector<2x8x8xf32>
    %71 = math.exp %70 : vector<2x8x8xf32>
    %cst_34 = arith.constant dense<0.000000e+00> : vector<2x8xf32>
    %72 = vector.multi_reduction <add>, %71, %cst_34 [2] : vector<2x8x8xf32> to vector<2x8xf32>
    %73 = vector.shape_cast %72 : vector<2x8xf32> to vector<2x8x1xf32>
    %74 = tpu.reciprocal %73 {approx = true} : vector<2x8x1xf32> -> vector<2x8x1xf32>
    %75 = vector.broadcast %74 : vector<2x8x1xf32> to vector<2x8x8xf32>
    %76 = arith.mulf %71, %75 : vector<2x8x8xf32>
    %77 = arith.truncf %76 : vector<2x8x8xf32> to vector<2x8x8xbf16>
    "tpu.trace_start"() <{level = 10 : i32, message = "bqk,bkd->bqd"}> : () -> ()
    %cst_35 = arith.constant dense<0.000000e+00> : vector<2x8x16xf32>
    %78 = tpu.matmul %77, %63, %cst_35 {dimension_numbers = #tpu.dot_dimension_numbers<[2], [1], [1], [2], [0, 0, 0, 1, 1, 2], [0], [0]>} : vector<2x8x8xbf16>, vector<2x8x16xbf16>, vector<2x8x16xf32> -> vector<2x8x16xf32>
    "tpu.trace_stop"() : () -> ()
    %79 = vector.shape_cast %78 : vector<2x8x16xf32> to vector<16x16xf32>
    %80 = arith.truncf %79 : vector<16x16xf32> to vector<16x16xbf16>
    %c6 = arith.constant 6 : index
    %c0_36 = arith.constant 0 : index
    %c0_37 = arith.constant 0 : index
    %81 = vector.load %arg2[%c6, %c0_36, %c0_37] : memref<16x32x16xbf16, #tpu.memory_space<vmem>>, vector<1x32x16xbf16>
    %82 = vector.shape_cast %81 : vector<1x32x16xbf16> to vector<32x16xbf16>
    %cst_38 = arith.constant dense<0.000000e+00> : vector<16x32xf32>
    %83 = tpu.matmul %80, %82, %cst_38 {dimension_numbers = #tpu.dot_dimension_numbers<[1], [1], [0], [0], [0, 0, 1, 0], [], []>} : vector<16x16xbf16>, vector<32x16xbf16>, vector<16x32xf32> -> vector<16x32xf32>
    %84 = vector.broadcast %45 : vector<1x32xf32> to vector<16x32xf32>
    %85 = arith.addf %84, %83 : vector<16x32xf32>
    %c1_39 = arith.constant 1 : index
    %c0_40 = arith.constant 0 : index
    %c0_41 = arith.constant 0 : index
    %86 = vector.load %arg2[%c1_39, %c0_40, %c0_41] : memref<16x32x16xbf16, #tpu.memory_space<vmem>>, vector<1x32x16xbf16>
    %87 = vector.shape_cast %86 : vector<1x32x16xbf16> to vector<32x16xbf16>
    %cst_42 = arith.constant dense<0.000000e+00> : vector<16x16xf32>
    %88 = tpu.matmul %43, %87, %cst_42 {dimension_numbers = #tpu.dot_dimension_numbers<[1], [0], [0], [1], [0, 0, 1, 1], [], []>} : vector<16x32xbf16>, vector<32x16xbf16>, vector<16x16xf32> -> vector<16x16xf32>
    %c3 = arith.constant 3 : index
    %c0_43 = arith.constant 0 : index
    %89 = vector.load %arg5[%c3, %c0_43] : memref<21x64xf32, #tpu.memory_space<vmem>>, vector<1x16xf32>
    %90 = vector.broadcast %89 : vector<1x16xf32> to vector<16x16xf32>
    %91 = arith.addf %88, %90 : vector<16x16xf32>
    %c3_44 = arith.constant 3 : index
    %c0_45 = arith.constant 0 : index
    %c0_46 = arith.constant 0 : index
    %92 = vector.load %arg2[%c3_44, %c0_45, %c0_46] : memref<16x32x16xbf16, #tpu.memory_space<vmem>>, vector<1x32x16xbf16>
    %93 = vector.shape_cast %92 : vector<1x32x16xbf16> to vector<32x16xbf16>
    %cst_47 = arith.constant dense<0.000000e+00> : vector<16x16xf32>
    %94 = tpu.matmul %44, %93, %cst_47 {dimension_numbers = #tpu.dot_dimension_numbers<[1], [0], [0], [1], [0, 0, 1, 1], [], []>} : vector<16x32xbf16>, vector<32x16xbf16>, vector<16x16xf32> -> vector<16x16xf32>
    %c5 = arith.constant 5 : index
    %c0_48 = arith.constant 0 : index
    %c0_49 = arith.constant 0 : index
    %95 = vector.load %arg2[%c5, %c0_48, %c0_49] : memref<16x32x16xbf16, #tpu.memory_space<vmem>>, vector<1x32x16xbf16>
    %96 = vector.shape_cast %95 : vector<1x32x16xbf16> to vector<32x16xbf16>
    %cst_50 = arith.constant dense<0.000000e+00> : vector<16x16xf32>
    %97 = tpu.matmul %44, %96, %cst_50 {dimension_numbers = #tpu.dot_dimension_numbers<[1], [0], [0], [1], [0, 0, 1, 1], [], []>} : vector<16x32xbf16>, vector<32x16xbf16>, vector<16x16xf32> -> vector<16x16xf32>
    %98 = vector.shape_cast %91 : vector<16x16xf32> to vector<2x8x16xf32>
    %99 = arith.truncf %98 : vector<2x8x16xf32> to vector<2x8x16xbf16>
    %100 = vector.shape_cast %94 : vector<16x16xf32> to vector<2x8x16xf32>
    %101 = arith.truncf %100 : vector<2x8x16xf32> to vector<2x8x16xbf16>
    %102 = vector.shape_cast %97 : vector<16x16xf32> to vector<2x8x16xf32>
    %103 = arith.truncf %102 : vector<2x8x16xf32> to vector<2x8x16xbf16>
    "tpu.trace_start"() <{level = 10 : i32, message = "bqd,bkd->bqk"}> : () -> ()
    %cst_51 = arith.constant dense<0.000000e+00> : vector<2x8x8xf32>
    %104 = tpu.matmul %99, %101, %cst_51 {dimension_numbers = #tpu.dot_dimension_numbers<[2], [2], [1], [1], [0, 0, 0, 1, 1, 1], [0], [0]>} : vector<2x8x16xbf16>, vector<2x8x16xbf16>, vector<2x8x8xf32> -> vector<2x8x8xf32>
    "tpu.trace_stop"() : () -> ()
    %cst_52 = arith.constant 2.500000e-01 : f32
    %105 = vector.broadcast %cst_52 : f32 to vector<2x8x8xf32>
    %106 = arith.mulf %104, %105 : vector<2x8x8xf32>
    %cst_53 = arith.constant dense<0xFF800000> : vector<2x8xf32>
    %107 = vector.multi_reduction <maximumf>, %106, %cst_53 [2] : vector<2x8x8xf32> to vector<2x8xf32>
    %108 = vector.shape_cast %107 : vector<2x8xf32> to vector<2x8x1xf32>
    %109 = vector.broadcast %108 : vector<2x8x1xf32> to vector<2x8x8xf32>
    %110 = arith.subf %106, %109 : vector<2x8x8xf32>
    %111 = math.exp %110 : vector<2x8x8xf32>
    %cst_54 = arith.constant dense<0.000000e+00> : vector<2x8xf32>
    %112 = vector.multi_reduction <add>, %111, %cst_54 [2] : vector<2x8x8xf32> to vector<2x8xf32>
    %113 = vector.shape_cast %112 : vector<2x8xf32> to vector<2x8x1xf32>
    %114 = tpu.reciprocal %113 {approx = true} : vector<2x8x1xf32> -> vector<2x8x1xf32>
    %115 = vector.broadcast %114 : vector<2x8x1xf32> to vector<2x8x8xf32>
    %116 = arith.mulf %111, %115 : vector<2x8x8xf32>
    %117 = arith.truncf %116 : vector<2x8x8xf32> to vector<2x8x8xbf16>
    "tpu.trace_start"() <{level = 10 : i32, message = "bqk,bkd->bqd"}> : () -> ()
    %cst_55 = arith.constant dense<0.000000e+00> : vector<2x8x16xf32>
    %118 = tpu.matmul %117, %103, %cst_55 {dimension_numbers = #tpu.dot_dimension_numbers<[2], [1], [1], [2], [0, 0, 0, 1, 1, 2], [0], [0]>} : vector<2x8x8xbf16>, vector<2x8x16xbf16>, vector<2x8x16xf32> -> vector<2x8x16xf32>
    "tpu.trace_stop"() : () -> ()
    %119 = vector.shape_cast %118 : vector<2x8x16xf32> to vector<16x16xf32>
    %120 = arith.truncf %119 : vector<16x16xf32> to vector<16x16xbf16>
    %c7 = arith.constant 7 : index
    %c0_56 = arith.constant 0 : index
    %c0_57 = arith.constant 0 : index
    %121 = vector.load %arg2[%c7, %c0_56, %c0_57] : memref<16x32x16xbf16, #tpu.memory_space<vmem>>, vector<1x32x16xbf16>
    %122 = vector.shape_cast %121 : vector<1x32x16xbf16> to vector<32x16xbf16>
    %cst_58 = arith.constant dense<0.000000e+00> : vector<16x32xf32>
    %123 = tpu.matmul %120, %122, %cst_58 {dimension_numbers = #tpu.dot_dimension_numbers<[1], [1], [0], [0], [0, 0, 1, 0], [], []>} : vector<16x16xbf16>, vector<32x16xbf16>, vector<16x32xf32> -> vector<16x32xf32>
    %124 = arith.addf %85, %123 : vector<16x32xf32>
    %125 = arith.addf %124, %42 : vector<16x32xf32>
    %cst_59 = arith.constant dense<0.000000e+00> : vector<16xf32>
    %126 = vector.multi_reduction <add>, %125, %cst_59 [1] : vector<16x32xf32> to vector<16xf32>
    %127 = vector.shape_cast %126 : vector<16xf32> to vector<16x1xf32>
    %cst_60 = arith.constant 3.200000e+01 : f32
    %128 = vector.broadcast %cst_60 : f32 to vector<16x1xf32>
    %129 = arith.divf %127, %128 : vector<16x1xf32>
    %130 = vector.broadcast %129 : vector<16x1xf32> to vector<16x32xf32>
    %131 = arith.subf %125, %130 : vector<16x32xf32>
    %132 = vector.broadcast %129 : vector<16x1xf32> to vector<16x32xf32>
    %133 = arith.subf %125, %132 : vector<16x32xf32>
    %134 = arith.mulf %131, %133 : vector<16x32xf32>
    %cst_61 = arith.constant dense<0.000000e+00> : vector<16xf32>
    %135 = vector.multi_reduction <add>, %134, %cst_61 [1] : vector<16x32xf32> to vector<16xf32>
    %136 = vector.shape_cast %135 : vector<16xf32> to vector<16x1xf32>
    %cst_62 = arith.constant 3.200000e+01 : f32
    %137 = vector.broadcast %cst_62 : f32 to vector<16x1xf32>
    %138 = arith.divf %136, %137 : vector<16x1xf32>
    %139 = vector.broadcast %129 : vector<16x1xf32> to vector<16x32xf32>
    %140 = arith.subf %125, %139 : vector<16x32xf32>
    %cst_63 = arith.constant 9.99999974E-6 : f32
    %141 = vector.broadcast %cst_63 : f32 to vector<16x1xf32>
    %142 = arith.addf %138, %141 : vector<16x1xf32>
    %143 = math.rsqrt %142 : vector<16x1xf32>
    %144 = vector.broadcast %143 : vector<16x1xf32> to vector<16x32xf32>
    %145 = arith.mulf %140, %144 : vector<16x32xf32>
    %c5_64 = arith.constant 5 : index
    %c0_65 = arith.constant 0 : index
    %146 = vector.load %arg5[%c5_64, %c0_65] : memref<21x64xf32, #tpu.memory_space<vmem>>, vector<1x32xf32>
    %147 = vector.broadcast %146 : vector<1x32xf32> to vector<16x32xf32>
    %148 = arith.mulf %145, %147 : vector<16x32xf32>
    %c6_66 = arith.constant 6 : index
    %c0_67 = arith.constant 0 : index
    %149 = vector.load %arg5[%c6_66, %c0_67] : memref<21x64xf32, #tpu.memory_space<vmem>>, vector<1x32xf32>
    %150 = vector.broadcast %149 : vector<1x32xf32> to vector<16x32xf32>
    %151 = arith.addf %148, %150 : vector<16x32xf32>
    %152 = arith.truncf %151 : vector<16x32xf32> to vector<16x32xbf16>
    %c0_68 = arith.constant 0 : index
    %c0_69 = arith.constant 0 : index
    %c0_70 = arith.constant 0 : index
    %153 = vector.load %arg3[%c0_68, %c0_69, %c0_70] : memref<4x32x64xbf16, #tpu.memory_space<vmem>>, vector<1x32x64xbf16>
    %154 = vector.shape_cast %153 : vector<1x32x64xbf16> to vector<32x64xbf16>
    %cst_71 = arith.constant dense<0.000000e+00> : vector<16x64xf32>
    %155 = tpu.matmul %152, %154, %cst_71 {dimension_numbers = #tpu.dot_dimension_numbers<[1], [0], [0], [1], [0, 0, 1, 1], [], []>} : vector<16x32xbf16>, vector<32x64xbf16>, vector<16x64xf32> -> vector<16x64xf32>
    %c7_72 = arith.constant 7 : index
    %c0_73 = arith.constant 0 : index
    %156 = vector.load %arg5[%c7_72, %c0_73] : memref<21x64xf32, #tpu.memory_space<vmem>>, vector<1x64xf32>
    %157 = vector.broadcast %156 : vector<1x64xf32> to vector<16x64xf32>
    %158 = arith.addf %155, %157 : vector<16x64xf32>
    %cst_74 = arith.constant 5.000000e-01 : f32
    %159 = vector.broadcast %cst_74 : f32 to vector<16x64xf32>
    %160 = arith.mulf %159, %158 : vector<16x64xf32>
    %cst_75 = arith.constant 4.471500e-02 : f32
    %161 = vector.broadcast %cst_75 : f32 to vector<16x64xf32>
    %162 = arith.mulf %161, %158 : vector<16x64xf32>
    %163 = arith.mulf %162, %158 : vector<16x64xf32>
    %164 = arith.mulf %163, %158 : vector<16x64xf32>
    %165 = arith.addf %158, %164 : vector<16x64xf32>
    %cst_76 = arith.constant 0.797884583 : f32
    %166 = vector.broadcast %cst_76 : f32 to vector<16x64xf32>
    %167 = arith.mulf %166, %165 : vector<16x64xf32>
    %168 = math.tanh %167 : vector<16x64xf32>
    %cst_77 = arith.constant 1.000000e+00 : f32
    %169 = vector.broadcast %cst_77 : f32 to vector<16x64xf32>
    %170 = arith.addf %169, %168 : vector<16x64xf32>
    %171 = arith.mulf %160, %170 : vector<16x64xf32>
    %172 = arith.truncf %171 : vector<16x64xf32> to vector<16x64xbf16>
    %c1_78 = arith.constant 1 : index
    %c0_79 = arith.constant 0 : index
    %c0_80 = arith.constant 0 : index
    %173 = vector.load %arg3[%c1_78, %c0_79, %c0_80] : memref<4x32x64xbf16, #tpu.memory_space<vmem>>, vector<1x32x64xbf16>
    %174 = vector.shape_cast %173 : vector<1x32x64xbf16> to vector<32x64xbf16>
    %cst_81 = arith.constant dense<0.000000e+00> : vector<16x32xf32>
    %175 = tpu.matmul %172, %174, %cst_81 {dimension_numbers = #tpu.dot_dimension_numbers<[1], [1], [0], [0], [0, 0, 1, 0], [], []>} : vector<16x64xbf16>, vector<32x64xbf16>, vector<16x32xf32> -> vector<16x32xf32>
    %c8 = arith.constant 8 : index
    %c0_82 = arith.constant 0 : index
    %176 = vector.load %arg5[%c8, %c0_82] : memref<21x64xf32, #tpu.memory_space<vmem>>, vector<1x32xf32>
    %177 = vector.broadcast %176 : vector<1x32xf32> to vector<16x32xf32>
    %178 = arith.addf %175, %177 : vector<16x32xf32>
    %179 = arith.addf %178, %151 : vector<16x32xf32>
    %cst_83 = arith.constant dense<0.000000e+00> : vector<16xf32>
    %180 = vector.multi_reduction <add>, %179, %cst_83 [1] : vector<16x32xf32> to vector<16xf32>
    %181 = vector.shape_cast %180 : vector<16xf32> to vector<16x1xf32>
    %cst_84 = arith.constant 3.200000e+01 : f32
    %182 = vector.broadcast %cst_84 : f32 to vector<16x1xf32>
    %183 = arith.divf %181, %182 : vector<16x1xf32>
    %184 = vector.broadcast %183 : vector<16x1xf32> to vector<16x32xf32>
    %185 = arith.subf %179, %184 : vector<16x32xf32>
    %186 = vector.broadcast %183 : vector<16x1xf32> to vector<16x32xf32>
    %187 = arith.subf %179, %186 : vector<16x32xf32>
    %188 = arith.mulf %185, %187 : vector<16x32xf32>
    %cst_85 = arith.constant dense<0.000000e+00> : vector<16xf32>
    %189 = vector.multi_reduction <add>, %188, %cst_85 [1] : vector<16x32xf32> to vector<16xf32>
    %190 = vector.shape_cast %189 : vector<16xf32> to vector<16x1xf32>
    %cst_86 = arith.constant 3.200000e+01 : f32
    %191 = vector.broadcast %cst_86 : f32 to vector<16x1xf32>
    %192 = arith.divf %190, %191 : vector<16x1xf32>
    %193 = vector.broadcast %183 : vector<16x1xf32> to vector<16x32xf32>
    %194 = arith.subf %179, %193 : vector<16x32xf32>
    %cst_87 = arith.constant 9.99999974E-6 : f32
    %195 = vector.broadcast %cst_87 : f32 to vector<16x1xf32>
    %196 = arith.addf %192, %195 : vector<16x1xf32>
    %197 = math.rsqrt %196 : vector<16x1xf32>
    %198 = vector.broadcast %197 : vector<16x1xf32> to vector<16x32xf32>
    %199 = arith.mulf %194, %198 : vector<16x32xf32>
    %c9 = arith.constant 9 : index
    %c0_88 = arith.constant 0 : index
    %200 = vector.load %arg5[%c9, %c0_88] : memref<21x64xf32, #tpu.memory_space<vmem>>, vector<1x32xf32>
    %201 = vector.broadcast %200 : vector<1x32xf32> to vector<16x32xf32>
    %202 = arith.mulf %199, %201 : vector<16x32xf32>
    %c10 = arith.constant 10 : index
    %c0_89 = arith.constant 0 : index
    %203 = vector.load %arg5[%c10, %c0_89] : memref<21x64xf32, #tpu.memory_space<vmem>>, vector<1x32xf32>
    %204 = vector.broadcast %203 : vector<1x32xf32> to vector<16x32xf32>
    %205 = arith.addf %202, %204 : vector<16x32xf32>
    %206 = vector.extract_strided_slice %205 {offsets = [0, 0], sizes = [1, 32], strides = [1, 1]} : vector<16x32xf32> to vector<1x32xf32>
    %207 = vector.extract_strided_slice %205 {offsets = [8, 0], sizes = [1, 32], strides = [1, 1]} : vector<16x32xf32> to vector<1x32xf32>
    %208 = tpu.concatenate %206, %207 in 0 : vector<1x32xf32>, vector<1x32xf32> -> vector<2x32xf32>
    %209 = arith.truncf %208 : vector<2x32xf32> to vector<2x32xbf16>
    %210 = arith.truncf %205 : vector<16x32xf32> to vector<16x32xbf16>
    %c13 = arith.constant 13 : index
    %c0_90 = arith.constant 0 : index
    %211 = vector.load %arg5[%c13, %c0_90] : memref<21x64xf32, #tpu.memory_space<vmem>>, vector<1x32xf32>
    %c8_91 = arith.constant 8 : index
    %c0_92 = arith.constant 0 : index
    %c0_93 = arith.constant 0 : index
    %212 = vector.load %arg2[%c8_91, %c0_92, %c0_93] : memref<16x32x16xbf16, #tpu.memory_space<vmem>>, vector<1x32x16xbf16>
    %213 = vector.shape_cast %212 : vector<1x32x16xbf16> to vector<32x16xbf16>
    %cst_94 = arith.constant dense<0.000000e+00> : vector<2x16xf32>
    %214 = tpu.matmul %209, %213, %cst_94 {dimension_numbers = #tpu.dot_dimension_numbers<[1], [0], [0], [1], [0, 0, 1, 1], [], []>} : vector<2x32xbf16>, vector<32x16xbf16>, vector<2x16xf32> -> vector<2x16xf32>
    %c11 = arith.constant 11 : index
    %c0_95 = arith.constant 0 : index
    %215 = vector.load %arg5[%c11, %c0_95] : memref<21x64xf32, #tpu.memory_space<vmem>>, vector<1x16xf32>
    %216 = vector.broadcast %215 : vector<1x16xf32> to vector<2x16xf32>
    %217 = arith.addf %214, %216 : vector<2x16xf32>
    %c10_96 = arith.constant 10 : index
    %c0_97 = arith.constant 0 : index
    %c0_98 = arith.constant 0 : index
    %218 = vector.load %arg2[%c10_96, %c0_97, %c0_98] : memref<16x32x16xbf16, #tpu.memory_space<vmem>>, vector<1x32x16xbf16>
    %219 = vector.shape_cast %218 : vector<1x32x16xbf16> to vector<32x16xbf16>
    %cst_99 = arith.constant dense<0.000000e+00> : vector<16x16xf32>
    %220 = tpu.matmul %210, %219, %cst_99 {dimension_numbers = #tpu.dot_dimension_numbers<[1], [0], [0], [1], [0, 0, 1, 1], [], []>} : vector<16x32xbf16>, vector<32x16xbf16>, vector<16x16xf32> -> vector<16x16xf32>
    %c12 = arith.constant 12 : index
    %c0_100 = arith.constant 0 : index
    %c0_101 = arith.constant 0 : index
    %221 = vector.load %arg2[%c12, %c0_100, %c0_101] : memref<16x32x16xbf16, #tpu.memory_space<vmem>>, vector<1x32x16xbf16>
    %222 = vector.shape_cast %221 : vector<1x32x16xbf16> to vector<32x16xbf16>
    %cst_102 = arith.constant dense<0.000000e+00> : vector<16x16xf32>
    %223 = tpu.matmul %210, %222, %cst_102 {dimension_numbers = #tpu.dot_dimension_numbers<[1], [0], [0], [1], [0, 0, 1, 1], [], []>} : vector<16x32xbf16>, vector<32x16xbf16>, vector<16x16xf32> -> vector<16x16xf32>
    %224 = vector.shape_cast %217 : vector<2x16xf32> to vector<2x1x16xf32>
    %225 = arith.truncf %224 : vector<2x1x16xf32> to vector<2x1x16xbf16>
    %226 = vector.shape_cast %220 : vector<16x16xf32> to vector<2x8x16xf32>
    %227 = arith.truncf %226 : vector<2x8x16xf32> to vector<2x8x16xbf16>
    %228 = vector.shape_cast %223 : vector<16x16xf32> to vector<2x8x16xf32>
    %229 = arith.truncf %228 : vector<2x8x16xf32> to vector<2x8x16xbf16>
    "tpu.trace_start"() <{level = 10 : i32, message = "bqd,bkd->bqk"}> : () -> ()
    %cst_103 = arith.constant dense<0.000000e+00> : vector<2x1x8xf32>
    %230 = tpu.matmul %225, %227, %cst_103 {dimension_numbers = #tpu.dot_dimension_numbers<[2], [2], [1], [1], [0, 0, 0, 1, 1, 1], [0], [0]>} : vector<2x1x16xbf16>, vector<2x8x16xbf16>, vector<2x1x8xf32> -> vector<2x1x8xf32>
    "tpu.trace_stop"() : () -> ()
    %cst_104 = arith.constant 2.500000e-01 : f32
    %231 = vector.broadcast %cst_104 : f32 to vector<2x1x8xf32>
    %232 = arith.mulf %230, %231 : vector<2x1x8xf32>
    %cst_105 = arith.constant dense<0xFF800000> : vector<2x1xf32>
    %233 = vector.multi_reduction <maximumf>, %232, %cst_105 [2] : vector<2x1x8xf32> to vector<2x1xf32>
    %234 = vector.shape_cast %233 : vector<2x1xf32> to vector<2x1x1xf32>
    %235 = vector.broadcast %234 : vector<2x1x1xf32> to vector<2x1x8xf32>
    %236 = arith.subf %232, %235 : vector<2x1x8xf32>
    %237 = math.exp %236 : vector<2x1x8xf32>
    %cst_106 = arith.constant dense<0.000000e+00> : vector<2x1xf32>
    %238 = vector.multi_reduction <add>, %237, %cst_106 [2] : vector<2x1x8xf32> to vector<2x1xf32>
    %239 = vector.shape_cast %238 : vector<2x1xf32> to vector<2x1x1xf32>
    %240 = tpu.reciprocal %239 {approx = true} : vector<2x1x1xf32> -> vector<2x1x1xf32>
    %241 = vector.broadcast %240 : vector<2x1x1xf32> to vector<2x1x8xf32>
    %242 = arith.mulf %237, %241 : vector<2x1x8xf32>
    %243 = arith.truncf %242 : vector<2x1x8xf32> to vector<2x1x8xbf16>
    "tpu.trace_start"() <{level = 10 : i32, message = "bqk,bkd->bqd"}> : () -> ()
    %cst_107 = arith.constant dense<0.000000e+00> : vector<2x1x16xf32>
    %244 = tpu.matmul %243, %229, %cst_107 {dimension_numbers = #tpu.dot_dimension_numbers<[2], [1], [1], [2], [0, 0, 0, 1, 1, 2], [0], [0]>} : vector<2x1x8xbf16>, vector<2x8x16xbf16>, vector<2x1x16xf32> -> vector<2x1x16xf32>
    "tpu.trace_stop"() : () -> ()
    %245 = vector.shape_cast %244 : vector<2x1x16xf32> to vector<2x16xf32>
    %246 = arith.truncf %245 : vector<2x16xf32> to vector<2x16xbf16>
    %c14 = arith.constant 14 : index
    %c0_108 = arith.constant 0 : index
    %c0_109 = arith.constant 0 : index
    %247 = vector.load %arg2[%c14, %c0_108, %c0_109] : memref<16x32x16xbf16, #tpu.memory_space<vmem>>, vector<1x32x16xbf16>
    %248 = vector.shape_cast %247 : vector<1x32x16xbf16> to vector<32x16xbf16>
    %cst_110 = arith.constant dense<0.000000e+00> : vector<2x32xf32>
    %249 = tpu.matmul %246, %248, %cst_110 {dimension_numbers = #tpu.dot_dimension_numbers<[1], [1], [0], [0], [0, 0, 1, 0], [], []>} : vector<2x16xbf16>, vector<32x16xbf16>, vector<2x32xf32> -> vector<2x32xf32>
    %250 = vector.broadcast %211 : vector<1x32xf32> to vector<2x32xf32>
    %251 = arith.addf %250, %249 : vector<2x32xf32>
    %c9_111 = arith.constant 9 : index
    %c0_112 = arith.constant 0 : index
    %c0_113 = arith.constant 0 : index
    %252 = vector.load %arg2[%c9_111, %c0_112, %c0_113] : memref<16x32x16xbf16, #tpu.memory_space<vmem>>, vector<1x32x16xbf16>
    %253 = vector.shape_cast %252 : vector<1x32x16xbf16> to vector<32x16xbf16>
    %cst_114 = arith.constant dense<0.000000e+00> : vector<2x16xf32>
    %254 = tpu.matmul %209, %253, %cst_114 {dimension_numbers = #tpu.dot_dimension_numbers<[1], [0], [0], [1], [0, 0, 1, 1], [], []>} : vector<2x32xbf16>, vector<32x16xbf16>, vector<2x16xf32> -> vector<2x16xf32>
    %c12_115 = arith.constant 12 : index
    %c0_116 = arith.constant 0 : index
    %255 = vector.load %arg5[%c12_115, %c0_116] : memref<21x64xf32, #tpu.memory_space<vmem>>, vector<1x16xf32>
    %256 = vector.broadcast %255 : vector<1x16xf32> to vector<2x16xf32>
    %257 = arith.addf %254, %256 : vector<2x16xf32>
    %c11_117 = arith.constant 11 : index
    %c0_118 = arith.constant 0 : index
    %c0_119 = arith.constant 0 : index
    %258 = vector.load %arg2[%c11_117, %c0_118, %c0_119] : memref<16x32x16xbf16, #tpu.memory_space<vmem>>, vector<1x32x16xbf16>
    %259 = vector.shape_cast %258 : vector<1x32x16xbf16> to vector<32x16xbf16>
    %cst_120 = arith.constant dense<0.000000e+00> : vector<16x16xf32>
    %260 = tpu.matmul %210, %259, %cst_120 {dimension_numbers = #tpu.dot_dimension_numbers<[1], [0], [0], [1], [0, 0, 1, 1], [], []>} : vector<16x32xbf16>, vector<32x16xbf16>, vector<16x16xf32> -> vector<16x16xf32>
    %c13_121 = arith.constant 13 : index
    %c0_122 = arith.constant 0 : index
    %c0_123 = arith.constant 0 : index
    %261 = vector.load %arg2[%c13_121, %c0_122, %c0_123] : memref<16x32x16xbf16, #tpu.memory_space<vmem>>, vector<1x32x16xbf16>
    %262 = vector.shape_cast %261 : vector<1x32x16xbf16> to vector<32x16xbf16>
    %cst_124 = arith.constant dense<0.000000e+00> : vector<16x16xf32>
    %263 = tpu.matmul %210, %262, %cst_124 {dimension_numbers = #tpu.dot_dimension_numbers<[1], [0], [0], [1], [0, 0, 1, 1], [], []>} : vector<16x32xbf16>, vector<32x16xbf16>, vector<16x16xf32> -> vector<16x16xf32>
    %264 = vector.shape_cast %257 : vector<2x16xf32> to vector<2x1x16xf32>
    %265 = arith.truncf %264 : vector<2x1x16xf32> to vector<2x1x16xbf16>
    %266 = vector.shape_cast %260 : vector<16x16xf32> to vector<2x8x16xf32>
    %267 = arith.truncf %266 : vector<2x8x16xf32> to vector<2x8x16xbf16>
    %268 = vector.shape_cast %263 : vector<16x16xf32> to vector<2x8x16xf32>
    %269 = arith.truncf %268 : vector<2x8x16xf32> to vector<2x8x16xbf16>
    "tpu.trace_start"() <{level = 10 : i32, message = "bqd,bkd->bqk"}> : () -> ()
    %cst_125 = arith.constant dense<0.000000e+00> : vector<2x1x8xf32>
    %270 = tpu.matmul %265, %267, %cst_125 {dimension_numbers = #tpu.dot_dimension_numbers<[2], [2], [1], [1], [0, 0, 0, 1, 1, 1], [0], [0]>} : vector<2x1x16xbf16>, vector<2x8x16xbf16>, vector<2x1x8xf32> -> vector<2x1x8xf32>
    "tpu.trace_stop"() : () -> ()
    %cst_126 = arith.constant 2.500000e-01 : f32
    %271 = vector.broadcast %cst_126 : f32 to vector<2x1x8xf32>
    %272 = arith.mulf %270, %271 : vector<2x1x8xf32>
    %cst_127 = arith.constant dense<0xFF800000> : vector<2x1xf32>
    %273 = vector.multi_reduction <maximumf>, %272, %cst_127 [2] : vector<2x1x8xf32> to vector<2x1xf32>
    %274 = vector.shape_cast %273 : vector<2x1xf32> to vector<2x1x1xf32>
    %275 = vector.broadcast %274 : vector<2x1x1xf32> to vector<2x1x8xf32>
    %276 = arith.subf %272, %275 : vector<2x1x8xf32>
    %277 = math.exp %276 : vector<2x1x8xf32>
    %cst_128 = arith.constant dense<0.000000e+00> : vector<2x1xf32>
    %278 = vector.multi_reduction <add>, %277, %cst_128 [2] : vector<2x1x8xf32> to vector<2x1xf32>
    %279 = vector.shape_cast %278 : vector<2x1xf32> to vector<2x1x1xf32>
    %280 = tpu.reciprocal %279 {approx = true} : vector<2x1x1xf32> -> vector<2x1x1xf32>
    %281 = vector.broadcast %280 : vector<2x1x1xf32> to vector<2x1x8xf32>
    %282 = arith.mulf %277, %281 : vector<2x1x8xf32>
    %283 = arith.truncf %282 : vector<2x1x8xf32> to vector<2x1x8xbf16>
    "tpu.trace_start"() <{level = 10 : i32, message = "bqk,bkd->bqd"}> : () -> ()
    %cst_129 = arith.constant dense<0.000000e+00> : vector<2x1x16xf32>
    %284 = tpu.matmul %283, %269, %cst_129 {dimension_numbers = #tpu.dot_dimension_numbers<[2], [1], [1], [2], [0, 0, 0, 1, 1, 2], [0], [0]>} : vector<2x1x8xbf16>, vector<2x8x16xbf16>, vector<2x1x16xf32> -> vector<2x1x16xf32>
    "tpu.trace_stop"() : () -> ()
    %285 = vector.shape_cast %284 : vector<2x1x16xf32> to vector<2x16xf32>
    %286 = arith.truncf %285 : vector<2x16xf32> to vector<2x16xbf16>
    %c15 = arith.constant 15 : index
    %c0_130 = arith.constant 0 : index
    %c0_131 = arith.constant 0 : index
    %287 = vector.load %arg2[%c15, %c0_130, %c0_131] : memref<16x32x16xbf16, #tpu.memory_space<vmem>>, vector<1x32x16xbf16>
    %288 = vector.shape_cast %287 : vector<1x32x16xbf16> to vector<32x16xbf16>
    %cst_132 = arith.constant dense<0.000000e+00> : vector<2x32xf32>
    %289 = tpu.matmul %286, %288, %cst_132 {dimension_numbers = #tpu.dot_dimension_numbers<[1], [1], [0], [0], [0, 0, 1, 0], [], []>} : vector<2x16xbf16>, vector<32x16xbf16>, vector<2x32xf32> -> vector<2x32xf32>
    %290 = arith.addf %251, %289 : vector<2x32xf32>
    %291 = arith.addf %290, %208 : vector<2x32xf32>
    %cst_133 = arith.constant dense<0.000000e+00> : vector<2xf32>
    %292 = vector.multi_reduction <add>, %291, %cst_133 [1] : vector<2x32xf32> to vector<2xf32>
    %293 = vector.shape_cast %292 : vector<2xf32> to vector<2x1xf32>
    %cst_134 = arith.constant 3.200000e+01 : f32
    %294 = vector.broadcast %cst_134 : f32 to vector<2x1xf32>
    %295 = arith.divf %293, %294 : vector<2x1xf32>
    %296 = vector.broadcast %295 : vector<2x1xf32> to vector<2x32xf32>
    %297 = arith.subf %291, %296 : vector<2x32xf32>
    %298 = vector.broadcast %295 : vector<2x1xf32> to vector<2x32xf32>
    %299 = arith.subf %291, %298 : vector<2x32xf32>
    %300 = arith.mulf %297, %299 : vector<2x32xf32>
    %cst_135 = arith.constant dense<0.000000e+00> : vector<2xf32>
    %301 = vector.multi_reduction <add>, %300, %cst_135 [1] : vector<2x32xf32> to vector<2xf32>
    %302 = vector.shape_cast %301 : vector<2xf32> to vector<2x1xf32>
    %cst_136 = arith.constant 3.200000e+01 : f32
    %303 = vector.broadcast %cst_136 : f32 to vector<2x1xf32>
    %304 = arith.divf %302, %303 : vector<2x1xf32>
    %305 = vector.broadcast %295 : vector<2x1xf32> to vector<2x32xf32>
    %306 = arith.subf %291, %305 : vector<2x32xf32>
    %cst_137 = arith.constant 9.99999974E-6 : f32
    %307 = vector.broadcast %cst_137 : f32 to vector<2x1xf32>
    %308 = arith.addf %304, %307 : vector<2x1xf32>
    %309 = math.rsqrt %308 : vector<2x1xf32>
    %310 = vector.broadcast %309 : vector<2x1xf32> to vector<2x32xf32>
    %311 = arith.mulf %306, %310 : vector<2x32xf32>
    %c14_138 = arith.constant 14 : index
    %c0_139 = arith.constant 0 : index
    %312 = vector.load %arg5[%c14_138, %c0_139] : memref<21x64xf32, #tpu.memory_space<vmem>>, vector<1x32xf32>
    %313 = vector.broadcast %312 : vector<1x32xf32> to vector<2x32xf32>
    %314 = arith.mulf %311, %313 : vector<2x32xf32>
    %c15_140 = arith.constant 15 : index
    %c0_141 = arith.constant 0 : index
    %315 = vector.load %arg5[%c15_140, %c0_141] : memref<21x64xf32, #tpu.memory_space<vmem>>, vector<1x32xf32>
    %316 = vector.broadcast %315 : vector<1x32xf32> to vector<2x32xf32>
    %317 = arith.addf %314, %316 : vector<2x32xf32>
    %318 = arith.truncf %317 : vector<2x32xf32> to vector<2x32xbf16>
    %c2_142 = arith.constant 2 : index
    %c0_143 = arith.constant 0 : index
    %c0_144 = arith.constant 0 : index
    %319 = vector.load %arg3[%c2_142, %c0_143, %c0_144] : memref<4x32x64xbf16, #tpu.memory_space<vmem>>, vector<1x32x64xbf16>
    %320 = vector.shape_cast %319 : vector<1x32x64xbf16> to vector<32x64xbf16>
    %cst_145 = arith.constant dense<0.000000e+00> : vector<2x64xf32>
    %321 = tpu.matmul %318, %320, %cst_145 {dimension_numbers = #tpu.dot_dimension_numbers<[1], [0], [0], [1], [0, 0, 1, 1], [], []>} : vector<2x32xbf16>, vector<32x64xbf16>, vector<2x64xf32> -> vector<2x64xf32>
    %c16 = arith.constant 16 : index
    %c0_146 = arith.constant 0 : index
    %322 = vector.load %arg5[%c16, %c0_146] : memref<21x64xf32, #tpu.memory_space<vmem>>, vector<1x64xf32>
    %323 = vector.broadcast %322 : vector<1x64xf32> to vector<2x64xf32>
    %324 = arith.addf %321, %323 : vector<2x64xf32>
    %cst_147 = arith.constant 5.000000e-01 : f32
    %325 = vector.broadcast %cst_147 : f32 to vector<2x64xf32>
    %326 = arith.mulf %325, %324 : vector<2x64xf32>
    %cst_148 = arith.constant 4.471500e-02 : f32
    %327 = vector.broadcast %cst_148 : f32 to vector<2x64xf32>
    %328 = arith.mulf %327, %324 : vector<2x64xf32>
    %329 = arith.mulf %328, %324 : vector<2x64xf32>
    %330 = arith.mulf %329, %324 : vector<2x64xf32>
    %331 = arith.addf %324, %330 : vector<2x64xf32>
    %cst_149 = arith.constant 0.797884583 : f32
    %332 = vector.broadcast %cst_149 : f32 to vector<2x64xf32>
    %333 = arith.mulf %332, %331 : vector<2x64xf32>
    %334 = math.tanh %333 : vector<2x64xf32>
    %cst_150 = arith.constant 1.000000e+00 : f32
    %335 = vector.broadcast %cst_150 : f32 to vector<2x64xf32>
    %336 = arith.addf %335, %334 : vector<2x64xf32>
    %337 = arith.mulf %326, %336 : vector<2x64xf32>
    %338 = arith.truncf %337 : vector<2x64xf32> to vector<2x64xbf16>
    %c3_151 = arith.constant 3 : index
    %c0_152 = arith.constant 0 : index
    %c0_153 = arith.constant 0 : index
    %339 = vector.load %arg3[%c3_151, %c0_152, %c0_153] : memref<4x32x64xbf16, #tpu.memory_space<vmem>>, vector<1x32x64xbf16>
    %340 = vector.shape_cast %339 : vector<1x32x64xbf16> to vector<32x64xbf16>
    %cst_154 = arith.constant dense<0.000000e+00> : vector<2x32xf32>
    %341 = tpu.matmul %338, %340, %cst_154 {dimension_numbers = #tpu.dot_dimension_numbers<[1], [1], [0], [0], [0, 0, 1, 0], [], []>} : vector<2x64xbf16>, vector<32x64xbf16>, vector<2x32xf32> -> vector<2x32xf32>
    %c17 = arith.constant 17 : index
    %c0_155 = arith.constant 0 : index
    %342 = vector.load %arg5[%c17, %c0_155] : memref<21x64xf32, #tpu.memory_space<vmem>>, vector<1x32xf32>
    %343 = vector.broadcast %342 : vector<1x32xf32> to vector<2x32xf32>
    %344 = arith.addf %341, %343 : vector<2x32xf32>
    %345 = arith.addf %344, %317 : vector<2x32xf32>
    %cst_156 = arith.constant dense<0.000000e+00> : vector<2xf32>
    %346 = vector.multi_reduction <add>, %345, %cst_156 [1] : vector<2x32xf32> to vector<2xf32>
    %347 = vector.shape_cast %346 : vector<2xf32> to vector<2x1xf32>
    %cst_157 = arith.constant 3.200000e+01 : f32
    %348 = vector.broadcast %cst_157 : f32 to vector<2x1xf32>
    %349 = arith.divf %347, %348 : vector<2x1xf32>
    %350 = vector.broadcast %349 : vector<2x1xf32> to vector<2x32xf32>
    %351 = arith.subf %345, %350 : vector<2x32xf32>
    %352 = vector.broadcast %349 : vector<2x1xf32> to vector<2x32xf32>
    %353 = arith.subf %345, %352 : vector<2x32xf32>
    %354 = arith.mulf %351, %353 : vector<2x32xf32>
    %cst_158 = arith.constant dense<0.000000e+00> : vector<2xf32>
    %355 = vector.multi_reduction <add>, %354, %cst_158 [1] : vector<2x32xf32> to vector<2xf32>
    %356 = vector.shape_cast %355 : vector<2xf32> to vector<2x1xf32>
    %cst_159 = arith.constant 3.200000e+01 : f32
    %357 = vector.broadcast %cst_159 : f32 to vector<2x1xf32>
    %358 = arith.divf %356, %357 : vector<2x1xf32>
    %359 = vector.broadcast %349 : vector<2x1xf32> to vector<2x32xf32>
    %360 = arith.subf %345, %359 : vector<2x32xf32>
    %cst_160 = arith.constant 9.99999974E-6 : f32
    %361 = vector.broadcast %cst_160 : f32 to vector<2x1xf32>
    %362 = arith.addf %358, %361 : vector<2x1xf32>
    %363 = math.rsqrt %362 : vector<2x1xf32>
    %364 = vector.broadcast %363 : vector<2x1xf32> to vector<2x32xf32>
    %365 = arith.mulf %360, %364 : vector<2x32xf32>
    %c18 = arith.constant 18 : index
    %c0_161 = arith.constant 0 : index
    %366 = vector.load %arg5[%c18, %c0_161] : memref<21x64xf32, #tpu.memory_space<vmem>>, vector<1x32xf32>
    %367 = vector.broadcast %366 : vector<1x32xf32> to vector<2x32xf32>
    %368 = arith.mulf %365, %367 : vector<2x32xf32>
    %c19 = arith.constant 19 : index
    %c0_162 = arith.constant 0 : index
    %369 = vector.load %arg5[%c19, %c0_162] : memref<21x64xf32, #tpu.memory_space<vmem>>, vector<1x32xf32>
    %370 = vector.broadcast %369 : vector<1x32xf32> to vector<2x32xf32>
    %371 = arith.addf %368, %370 : vector<2x32xf32>
    %372 = arith.truncf %371 : vector<2x32xf32> to vector<2x32xbf16>
    %c0_163 = arith.constant 0 : index
    %c0_164 = arith.constant 0 : index
    %373 = vector.load %arg4[%c0_163, %c0_164] : memref<32x32xbf16, #tpu.memory_space<vmem>>, vector<32x32xbf16>
    %cst_165 = arith.constant dense<0.000000e+00> : vector<2x32xf32>
    %374 = tpu.matmul %372, %373, %cst_165 {dimension_numbers = #tpu.dot_dimension_numbers<[1], [0], [0], [1], [0, 0, 1, 1], [], []>} : vector<2x32xbf16>, vector<32x32xbf16>, vector<2x32xf32> -> vector<2x32xf32>
    %c20 = arith.constant 20 : index
    %c0_166 = arith.constant 0 : index
    %375 = vector.load %arg5[%c20, %c0_166] : memref<21x64xf32, #tpu.memory_space<vmem>>, vector<1x32xf32>
    %376 = vector.broadcast %375 : vector<1x32xf32> to vector<2x32xf32>
    %377 = arith.addf %374, %376 : vector<2x32xf32>
    %378 = math.tanh %377 : vector<2x32xf32>
    %c0_167 = arith.constant 0 : index
    %c0_168 = arith.constant 0 : index
    %379 = vector.load %arg6[%c0_167, %c0_168] : memref<2x32xf32, #tpu.memory_space<vmem>>, vector<2x32xf32>
    tpu.vector_store %arg6[%c0_167, %c0_168], %378 {strides = array<i32>} : memref<2x32xf32, #tpu.memory_space<vmem>>, vector<2x32xf32>,
    return
  }
}

</mosaic_0001>

<bundles_post_ra>
// kernel: camem_forward.1
= control target key start
LH: loop header
LB: loop body
LE: loop exit
PB: predicated region body
PF: predicated region fallthrough
CT: control target
= control target key end

     0   :  { %v2080_v2 = vmov 1   ;;  %v2081_v3 = vmov 0   ;;  %s2490_s0 = inlined_call_operand.vmem [shape: s32[16,2], index: 0, kind: input, shape index: {}]   ;;  %s2491_s1 = inlined_call_operand.vmem [shape: bf16[128,32], index: 1, kind: input, shape index: {}]   ;;  %s2492_s2 = inlined_call_operand.vmem [shape: bf16[16,32,16], index: 2, kind: input, shape index: {}]   ;;  %s2493_s3 = inlined_call_operand.vmem [shape: bf16[4,32,64], index: 3, kind: input, shape index: {}]   ;;  %s2494_s4 = inlined_call_operand.vmem [shape: bf16[32,32], index: 4, kind: input, shape index: {}]   ;;  %s2495_s5 = inlined_call_operand.vmem [shape: f32[21,64], index: 5, kind: input, shape index: {}]   ;;  %s2496_s6 = inlined_call_operand.hbm [shape: f32[2,32], index: 6, kind: output, shape index: {}]  }
   0x1   :  { %v25_v0 = vld [vmem:[%s2490_s0] sm:$0xff]  ;;  %v1924_v1 = vld [vmem:[%s2491_s1 + $0x38] sm:$0xff]  ;;  %1973 = vset.pattern.permute.xlu1 %v2080_v2  ;;  %1972 = vset.pattern.permute.xlu0 %v2081_v3  ;;  %v1923_v4 = vld [vmem:[%s2491_s1 + $0x30] sm:$0xff] }
   0x2   :  { %40 = vperm.xlu1 %1973, %v25_v0   ;;  %30 = vperm.xlu0 %1972, %v25_v0   ;;  %v26_v5 = vld [vmem:[%s2490_s0 + $0x8] sm:$0xff] }
   0x3   :  { %116 = vmatpush.bf16.msra.mxu0 %v1924_v1  ;;  %v1922_v6 = vld [vmem:[%s2491_s1 + $0x28] sm:$0xff] }
   0x7   :  { %117 = vmatpush.bf16.msra.mxu0 %v1923_v4 }
   0x8   :  { %11 = vsyncpa [#allocation3], 0  ;;  %v1921_v7 = vld [vmem:[%s2491_s1 + $0x20] sm:$0xff]  ;;  %v1920_v8 = vld [vmem:[%s2491_s1 + $0x18] sm:$0xff]  ;;  %v27_v12 = vlaneseq  ;;  %v2082_v16 = vmov 0.0   ;;  %vm130_vm4 = vcmask 261120  }
   0x9   :  { %v1919_v9 = vld [vmem:[%s2491_s1 + $0x10] sm:$0xff]  ;;  %v1918_v10 = vld [vmem:[%s2491_s1 + $0x8] sm:$0xff]  ;;  %v1917_v11 = vld [vmem:[%s2491_s1] sm:$0xff]  ;;  %v2083_v30 = vmov 32.0   ;;  %vm364_vm12 = vcmask 1043456   ;;  %vm295_vm13 = vcmask 130048  }
   0xa   :  { %43 = vperm.xlu1 %1973, %v26_v5   ;;  %33 = vperm.xlu0 %1972, %v26_v5   ;;  %v28_v15 = vand.u32 127, %v27_v12  ;;  %1996 = vrcp.f32 %v2083_v30  ;;  %v1926_v47 = vld [vmem:[%s2492_s2 + $0x8] sm:$0xff]  ;;  %v1936_v50 = vld [vmem:[%s2492_s2 + $0x38] sm:$0xff]  ;;  %v1925_v53 = vld [vmem:[%s2492_s2] sm:$0xff]  ;;  %vm336_vm14 = vcmask 64512   ;;  %s2084_s10 = smov [#allocation2]  }
   0xb   :  { %118 = vmatpush.bf16.msra.mxu0 %v1922_v6  ;;  %v1928_v48 = vld [vmem:[%s2492_s2 + $0x28] sm:$0xff]  ;;  %219 = vmatpush.bf16.msra.mxu1 %v1926_v47  ;;  %v1927_v54 = vld [vmem:[%s2492_s2 + $0x20] sm:$0xff]  ;;  %v1935_v57 = vld [vmem:[%s2492_s2 + $0x30] sm:$0xff]  ;;  %s1597_s0 = sshll.u32 %s2084_s10, 4  ;;  %s1599_s12 = sshll.u32 %s2496_s6, 4  ;;  %s1598_s0 = int_to_ptr.vmem [resolvable:$true] %s1597_s0  ;;  %s1600_s12 = int_to_ptr.hbm [resolvable:$true] %s1599_s12 }
   0xc   :  { %v1930_v49 = vld [vmem:[%s2492_s2 + $0x48] sm:$0xff]  ;;  %250 = vmatpush.bf16.msra.mxu2 %v1928_v48  ;;  %v1929_v55 = vld [vmem:[%s2492_s2 + $0x40] sm:$0xff] }
   0xd   :  { %281 = vmatpush.bf16.msra.mxu3 %v1930_v49 }
   0xf   :  { %119 = vmatpush.bf16.msra.mxu0 %v1921_v7  ;;  %220 = vmatpush.bf16.msra.mxu1 %v1925_v53 }
  0x10   :  { %v1997_v31 = vpop.eup %1996  ;;  %251 = vmatpush.bf16.msra.mxu2 %v1927_v54 }
  0x11   :  { %v138_v32 = vmul.f32 32.0, %v1997_v31  ;;  %vm142_vm5 = vweird.f32 %v1997_v31  ;;  %282 = vmatpush.bf16.msra.mxu3 %v1929_v55 }
  0x12   :  { %1974 = vset.pattern.permute.xlu0 %v2080_v2 }
  0x13   :  { %120 = vmatpush.bf16.msra.mxu0 %v1920_v8  ;;  %v139_v33 = vsub.f32 1.0, %v138_v32 }
  0x15   :  { %v140_v34 = vmul.f32 %v1997_v31, %v139_v33 }
  0x17   :  { %121 = vmatpush.bf16.msra.mxu0 %v1919_v9  ;;  %v141_v35 = vadd.f32 %v1997_v31, %v140_v34  ;;  %v1975_v9 = vld [vmem:[%s2495_s5] ss:$0 sm:$0xff] }
  0x19   :  { %v2152_v36 = vsel %vm142_vm5, %v1997_v31, %v141_v35 }
  0x1b   :  { %122 = vmatpush.bf16.msra.mxu0 %v1918_v10 }
  0x1f   :  { %123 = vmatpush.bf16.msra.mxu0 %v1917_v11 }
  0x23   :  { %498 = vmatpush.bf16.msrb.mxu0 %v1936_v50 }
  0x27   :  { %499 = vmatpush.bf16.msrb.mxu0 %v1935_v57 }
  0x74   :  { %v41_v13 = vpop.permute.xlu1 %40  ;;  %v31_v14 = vpop.permute.xlu0 %30 }
  0x75   :  { %vm45_vm0 = vcmp.eq.s32.totalorder %v28_v15, %v41_v13  ;;  %vm35_vm1 = vcmp.eq.s32.totalorder %v28_v15, %v31_v14  ;;  %v1976_v13 = vld [vmem:[%s2495_s5 + $0x1] ss:$0 sm:$0xff] }
  0x76   :  { %v47_v17 = vsel %vm45_vm0, 1.0, %v2082_v16  ;;  %v37_v18 = vsel %vm35_vm1, 1.0, %v2082_v16 }
  0x77   :  { %v49_v23 = vadd.f32 %v47_v17, %v37_v18 }
  0x7c   :  { %v44_v19 = vpop.permute.xlu1 %43  ;;  %v34_v20 = vpop.permute.xlu0 %33 }
  0x7d   :  { %vm46_vm2 = vcmp.eq.s32.totalorder %v28_v15, %v44_v19  ;;  %vm36_vm3 = vcmp.eq.s32.totalorder %v28_v15, %v34_v20 }
  0x7e   :  { %v48_v21 = vsel %vm46_vm2, 1.0, %v2082_v16  ;;  %v38_v22 = vsel %vm36_vm3, 1.0, %v2082_v16 }
  0x7f   :  { %v50_v24 = vadd.f32 %v48_v21, %v38_v22  ;;  %v1977_v22 = vld [vmem:[%s2495_s5 + $0x2] ss:$0 sm:$0xff] }
  0x81   :  { %v51_v25 = vpack.c.bf16 %v50_v24, %v49_v23 }
  0x83   :  { %124 = vmatmul.bf16.vlgmr.msra.gmra.mxu0 %v51_v25 }
 0x100   :  { %v125_v26 = vpop.f32.mrf.mxu0 }
 0x101   :  { %v131_v27 = vsel %vm130_vm4, %v125_v26, 0.0 }
 0x102   :  { %132 = vadd.xlane.f32.xlu2 %v131_v27 }
 0x108   :  { %v127_v28 = vpop.f32.mrf.mxu0 }
 0x109   :  { %v134_v29 = vsel %vm130_vm4, %v127_v28, 0.0 }
 0x10a   :  { %135 = vadd.xlane.f32.xlu2 %v134_v29  ;;  %v1932_v29 = vld [vmem:[%s2492_s2 + $0x68] sm:$0xff] }
 0x175   :  { %v133_v37 = vpop.xlane.xlu2 %132 }
 0x176   :  { %v144_v38 = vmul.f32 %v2152_v36, %v133_v37  ;;  %v423_v37 = vsel %vm295_vm13, %v1932_v29, 0 }
 0x178   :  { %v146_v39 = vsub.f32 %v125_v26, %v144_v38 }
 0x17a   :  { %v148_v40 = vmul.f32 %v146_v39, %v146_v39 }
 0x17c   :  { %v150_v41 = vsel %vm130_vm4, %v148_v40, 0.0 }
 0x17d   :  { %151 = vadd.xlane.f32.xlu0 %v150_v41  ;;  %v136_v42 = vpop.xlane.xlu2 %135 }
 0x17e   :  { %v145_v43 = vmul.f32 %v2152_v36, %v136_v42  ;;  %v1931_v42 = vld [vmem:[%s2492_s2 + $0x60] sm:$0xff] }
 0x180   :  { %v147_v44 = vsub.f32 %v127_v28, %v145_v43 }
 0x182   :  { %v149_v45 = vmul.f32 %v147_v44, %v147_v44 }
 0x184   :  { %v153_v46 = vsel %vm130_vm4, %v149_v45, 0.0  ;;  %v420_v45 = vsel %vm295_vm13, %v1931_v42, 0 }
 0x185   :  { %154 = vadd.xlane.f32.xlu1 %v153_v46 }
 0x1f0   :  { %v152_v51 = vpop.xlane.xlu0 %151 }
 0x1f1   :  { %v156_v52 = vmul.f32 %v152_v51, %v2152_v36 }
 0x1f3   :  { %v158_v56 = vadd.f32 1e-05, %v156_v52 }
 0x1f5   :  { %1998 = vrsqrt.f32 %v158_v56  ;;  %vm166_vm7 = vweird.f32 %v158_v56 }
 0x1f8   :  { %v155_v58 = vpop.xlane.xlu1 %154 }
 0x1f9   :  { %v157_v59 = vmul.f32 %v155_v58, %v2152_v36 }
 0x1fb   :  { %v1999_v60 = vpop.eup %1998  ;;  %v159_v61 = vadd.f32 1e-05, %v157_v59 }
 0x1fc   :  { %v161_v62 = vmul.f32 %v1999_v60, %v158_v56  ;;  %vm167_vm6 = vweird.f32 %v1999_v60 }
 0x1fd   :  { %2000 = vrsqrt.f32 %v159_v61  ;;  %vm168_vm8 = vmor %vm166_vm7, %vm167_vm6  ;;  %vm176_vm10 = vweird.f32 %v159_v61  ;;  %vm812_vm6 = vcmask 523264  }
 0x1fe   :  { %v162_v63 = vmul.f32 %v1999_v60, %v161_v62 }
 0x200   :  { %v163_v0 = vmul.f32 0.5, %v162_v63 }
 0x202   :  { %v164_v1 = vsub.f32 1.5, %v163_v0 }
 0x203   :  { %v2001_v2 = vpop.eup %2000 }
 0x204   :  { %v165_v3 = vmul.f32 %v1999_v60, %v164_v1  ;;  %v171_v4 = vmul.f32 %v2001_v2, %v159_v61  ;;  %vm177_vm9 = vweird.f32 %v2001_v2  ;;  %v1934_v1 = vld [vmem:[%s2492_s2 + $0x18] sm:$0xff] }
 0x205   :  { %vm178_vm11 = vmor %vm176_vm10, %vm177_vm9 }
 0x206   :  { %v172_v5 = vmul.f32 %v2001_v2, %v171_v4  ;;  %v169_v6 = vsel %vm168_vm8, %v1999_v60, %v165_v3  ;;  %v1938_v3 = vld [vmem:[%s2492_s2 + $0x58] sm:$0xff]  ;;  %v1937_v4 = vld [vmem:[%s2492_s2 + $0x50] sm:$0xff] }
 0x207   :  { %v180_v10 = vmul.f32 %v169_v6, %v146_v39 }
 0x208   :  { %v173_v7 = vmul.f32 0.5, %v172_v5 }
 0x209   :  { %v184_v14 = vmul.f32 %v1975_v9, %v180_v10 }
 0x20a   :  { %v174_v8 = vsub.f32 1.5, %v173_v7 }
 0x20b   :  { %v2190_v17 = vadd.f32 %v1976_v13, %v184_v14 }
 0x20c   :  { %v175_v11 = vmul.f32 %v2001_v2, %v174_v8 }
 0x20e   :  { %v179_v12 = vsel %vm178_vm11, %v2001_v2, %v175_v11  ;;  %v1933_v2 = vld [vmem:[%s2492_s2 + $0x10] sm:$0xff] }
 0x20f   :  { %v181_v15 = vmul.f32 %v179_v12, %v147_v44 }
 0x211   :  { %v185_v16 = vmul.f32 %v1975_v9, %v181_v15 }
 0x213   :  { %v2192_v18 = vadd.f32 %v1976_v13, %v185_v16 }
 0x215   :  { %v2196_v19 = vpack.c.bf16 %v2192_v18, %v2190_v17 }
 0x217   :  { %1648 = vmatmul.msk.bf16.vlgmr.msra.gmra.mxu1 %vm130_vm4, %v2196_v19  ;;  %1661 = vmatmul.msk.bf16.vlgmr.msra.gmra.mxu2 %vm130_vm4, %v2196_v19 }
 0x218   :  { %1674 = vmatmul.msk.bf16.vlgmr.msra.gmra.mxu3 %vm130_vm4, %v2196_v19  ;;  %1717 = vmatmul.msk.bf16.vlgmr.msrb.gmra.mxu0 %vm130_vm4, %v2196_v19 }
 0x294   :  { %v222_v20 = vpop.f32.mrf.mxu1 }
 0x295   :  { %v223_v28 = vadd.f32 %v1977_v22, %v222_v20  ;;  %v501_v41 = vpop.f32.mrf.mxu0 }
 0x296   :  { %v539_v43 = vpack.c.bf16 %v501_v41, %v501_v41 }
 0x297   :  { %v289_v31 = vpack.c.bf16 %v223_v28, %v223_v28 }
 0x298   :  { %v547_v46 = vsel %vm295_vm13, %v539_v43, 0 }
 0x29a   :  { %v253_v21 = vpop.f32.mrf.mxu2 }
 0x29b   :  { %v291_v23 = vpack.c.bf16 %v253_v21, %v253_v21  ;;  %v284_v24 = vpop.f32.mrf.mxu3 }
 0x29c   :  { %v293_v25 = vpack.c.bf16 %v284_v24, %v284_v24  ;;  %v224_v34 = vpop.f32.mrf.mxu1 }
 0x29d   :  { %v300_v26 = vsel %vm295_vm13, %v291_v23, 0  ;;  %v225_v40 = vadd.f32 %v1977_v22, %v224_v34  ;;  %v503_v6 = vpop.f32.mrf.mxu0 }
 0x29e   :  { %309 = vmatpush.bf16.xpose.msrb.mxu1 %v300_v26  ;;  %v366_v27 = vsel %vm364_vm12, %v293_v25, 0  ;;  %v540_v8 = vpack.c.bf16 %v503_v6, %v503_v6  ;;  %v1978_v25 = vld [vmem:[%s2495_s5 + $0x3] ss:$0 sm:$0xff] }
 0x29f   :  { %375 = vmatpush.bf16.msrb.mxu3 %v366_v27  ;;  %v290_v44 = vpack.c.bf16 %v225_v40, %v225_v40 }
 0x2a0   :  { %v566_v11 = vsel %vm295_vm13, %v540_v8, 0 }
 0x2a2   :  { %v255_v30 = vpop.f32.mrf.mxu2 }
 0x2a3   :  { %v292_v32 = vpack.c.bf16 %v255_v30, %v255_v30  ;;  %v286_v33 = vpop.f32.mrf.mxu3  ;;  %467 = vmatpush.bf16.msra.mxu3 %v1934_v1 }
 0x2a4   :  { %v294_v35 = vpack.c.bf16 %v286_v33, %v286_v33 }
 0x2a5   :  { %1675 = vmatmul.msk.bf16.vlgmr.msrb.gmra.mxu1 %vm295_vm13, %v289_v31  ;;  %v319_v38 = vsel %vm295_vm13, %v292_v32, 0 }
 0x2a6   :  { %v385_v39 = vsel %vm364_vm12, %v294_v35, 0  ;;  %328 = vmatpush.bf16.xpose.msrb.mxu2 %v319_v38 }
 0x2a7   :  { %394 = vmatpush.bf16.msra.mxu1 %v385_v39  ;;  %468 = vmatpush.bf16.msra.mxu3 %v1933_v2 }
 0x2ab   :  { %529 = vmatpush.bf16.msrb.mxu1 %v1938_v3  ;;  %v1939_v3 = vld [vmem:[%s2492_s2 + $0x70] sm:$0xff] }
 0x2ad   :  { %1676 = vmatmul.msk.bf16.vlgmr.msrb.gmra.mxu2 %vm295_vm13, %v290_v44 }
 0x2ae   :  { %431 = vmatpush.bf16.xpose.msra.mxu2 %v423_v37 }
 0x2af   :  { %530 = vmatpush.bf16.msrb.mxu1 %v1937_v4  ;;  %v665_v4 = vsel %vm295_vm13, %v1939_v3, 0  ;;  %v1982_v3 = vld [vmem:[%s2495_s5 + $0x7] ss:$0 sm:$0xff] }
 0x2b6   :  { %432 = vmatpush.bf16.xpose.msra.mxu2 %v420_v45 }
 0x2be   :  { %556 = vmatpush.bf16.xpose.msrb.mxu2 %v547_v46 }
 0x322   :  { %v311_v47 = vpop.f32.mrf.mxu1 }
 0x323   :  { %v334_v48 = vmul.f32 0.25, %v311_v47 }
 0x325   :  { %v337_v49 = vsel %vm336_vm14, %v334_v48, -inf }
 0x326   :  { %338 = vmax.xlane.f32.xlu2 %v337_v49 }
 0x32a   :  { %v313_v50 = vpop.f32.mrf.mxu1 }
 0x330   :  { %v330_v51 = vpop.f32.mrf.mxu2 }
 0x331   :  { %v335_v52 = vmul.f32 0.25, %v330_v51 }
 0x333   :  { %v340_v53 = vsel %vm336_vm14, %v335_v52, -inf }
 0x334   :  { %341 = vmax.xlane.f32.xlu2 %v340_v53 }
 0x338   :  { %v332_v54 = vpop.f32.mrf.mxu2 }
 0x399   :  { %v339_v55 = vpop.xlane.xlu2 %338 }
 0x39a   :  { %v343_v56 = vsub.f32 %v334_v48, %v339_v55 }
 0x39c   :  { %v345_v57 = vmul.f32 1.442695, %v343_v56 }
 0x39e   :  { %2002 = vpow2.f32 %v345_v57  ;;  %v1940_v57 = vld [vmem:[%s2492_s2 + $0x78] sm:$0xff] }
 0x3a4   :  { %v2003_v58 = vpop.eup %2002 }
 0x3a5   :  { %v349_v59 = vsel %vm336_vm14, %v2003_v58, 0.0 }
 0x3a6   :  { %350 = vadd.xlane.f32.xlu2 %v349_v59 }
 0x3a7   :  { %v342_v60 = vpop.xlane.xlu2 %341 }
 0x3a8   :  { %v344_v61 = vsub.f32 %v335_v52, %v342_v60 }
 0x3aa   :  { %v347_v62 = vmul.f32 1.442695, %v344_v61 }
 0x3ac   :  { %2004 = vpow2.f32 %v347_v62 }
 0x3b2   :  { %v2005_v63 = vpop.eup %2004 }
 0x3b3   :  { %v352_v0 = vsel %vm336_vm14, %v2005_v63, 0.0 }
 0x3b4   :  { %353 = vadd.xlane.f32.xlu2 %v352_v0 }
 0x419   :  { %v351_v5 = vpop.xlane.xlu2 %350 }
 0x41a   :  { %2006 = vrcp.f32 %v351_v5 }
 0x420   :  { %v2007_v7 = vpop.eup %2006 }
 0x421   :  { %v357_v9 = vmul.f32 %v2007_v7, %v2003_v58  ;;  %v668_v58 = vsel %vm295_vm13, %v1940_v57, 0 }
 0x423   :  { %v359_v10 = vpack.c.bf16 %v357_v9, %v357_v9 }
 0x425   :  { %1677 = vmatmul.msk.bf16.vlgmr.msrb.gmra.mxu3 %vm336_vm14, %v359_v10  ;;  %v1979_v10 = vld [vmem:[%s2495_s5 + $0x4] ss:$0 sm:$0xff] }
 0x426   :  { %575 = vmatpush.bf16.xpose.msrb.mxu3 %v566_v11 }
 0x427   :  { %v354_v12 = vpop.xlane.xlu2 %353 }
 0x428   :  { %2008 = vrcp.f32 %v354_v12 }
 0x42e   :  { %v2009_v13 = vpop.eup %2008 }
 0x42f   :  { %v358_v14 = vmul.f32 %v2009_v13, %v2005_v63 }
 0x431   :  { %v360_v15 = vpack.c.bf16 %v358_v14, %v358_v14 }
 0x433   :  { %1678 = vmatmul.msk.bf16.vlgmr.msra.gmra.mxu1 %vm336_vm14, %v360_v15 }
 0x435   :  { %1704 = vmatmul.msk.bf16.vlgmr.msra.gmra.mxu3 %vm130_vm4, %v2196_v19 }
 0x443   :  { %1730 = vmatmul.msk.bf16.vlgmr.msrb.gmra.mxu1 %vm130_vm4, %v2196_v19 }
 0x4a8   :  { %v377_v16 = vpop.f32.mrf.mxu3 }
 0x4b0   :  { %v379_v20 = vpop.f32.mrf.mxu3  ;;  %v396_v21 = vpop.f32.mrf.mxu1 }
 0x4b1   :  { %v400_v22 = vpack.c.bf16 %v396_v21, %v377_v16 }
 0x4b3   :  { %1691 = vmatmul.msk.bf16.vlgmr.msra.gmra.mxu2 %vm295_vm13, %v400_v22 }
 0x4b4   :  { %676 = vmatpush.bf16.xpose.msra.mxu2 %v668_v58 }
 0x4b8   :  { %v398_v23 = vpop.f32.mrf.mxu1  ;;  %v470_v24 = vpop.f32.mrf.mxu3 }
 0x4b9   :  { %v471_v26 = vadd.f32 %v1978_v25, %v470_v24 }
 0x4bb   :  { %v537_v29 = vpack.c.bf16 %v471_v26, %v471_v26 }
 0x4bc   :  { %677 = vmatpush.bf16.xpose.msra.mxu2 %v665_v4 }
 0x4c0   :  { %v472_v27 = vpop.f32.mrf.mxu3  ;;  %v532_v28 = vpop.f32.mrf.mxu1 }
 0x4c1   :  { %v473_v30 = vadd.f32 %v1978_v25, %v472_v27  ;;  %v541_v31 = vpack.c.bf16 %v532_v28, %v532_v28 }
 0x4c3   :  { %v538_v32 = vpack.c.bf16 %v473_v30, %v473_v30  ;;  %v611_v19 = vsel %vm364_vm12, %v541_v31, 0  ;;  %1731 = vmatmul.msk.bf16.vlgmr.msrb.gmra.mxu2 %vm295_vm13, %v537_v29 }
 0x4c4   :  { %620 = vmatpush.bf16.msra.mxu0 %v611_v19 }
 0x4c5   :  { %1732 = vmatmul.msk.bf16.vlgmr.msrb.gmra.mxu3 %vm295_vm13, %v538_v32 }
 0x4c8   :  { %v534_v33 = vpop.f32.mrf.mxu1 }
 0x4c9   :  { %v542_v34 = vpack.c.bf16 %v534_v33, %v534_v33 }
 0x4cb   :  { %v630_v35 = vsel %vm364_vm12, %v542_v34, 0 }
 0x4cc   :  { %639 = vmatpush.bf16.msra.mxu1 %v630_v35  ;;  %v1941_v35 = vld [vmem:[%s2493_s3] sm:$0xff] }
 0x536   :  { %v434_v37 = vpop.f32.mrf.mxu2 }
 0x537   :  { %v440_v11 = vadd.f32 %v1979_v10, %v434_v37 }
 0x53e   :  { %v436_v38 = vpop.f32.mrf.mxu2 }
 0x53f   :  { %v441_v16 = vadd.f32 %v1979_v10, %v436_v38 }
 0x546   :  { %v558_v39 = vpop.f32.mrf.mxu2 }
 0x547   :  { %v581_v40 = vmul.f32 0.25, %v558_v39 }
 0x548   :  { %v577_v41 = vpop.f32.mrf.mxu3 }
 0x549   :  { %v583_v42 = vsel %vm336_vm14, %v581_v40, -inf  ;;  %v582_v43 = vmul.f32 0.25, %v577_v41 }
 0x54a   :  { %584 = vmax.xlane.f32.xlu2 %v583_v42 }
 0x54b   :  { %v586_v46 = vsel %vm336_vm14, %v582_v43, -inf }
 0x54e   :  { %v560_v44 = vpop.f32.mrf.mxu2 }
 0x550   :  { %v579_v45 = vpop.f32.mrf.mxu3 }
 0x552   :  { %587 = vmax.xlane.f32.xlu2 %v586_v46 }
 0x5bd   :  { %v585_v47 = vpop.xlane.xlu2 %584 }
 0x5be   :  { %v589_v48 = vsub.f32 %v581_v40, %v585_v47 }
 0x5c0   :  { %v591_v49 = vmul.f32 1.442695, %v589_v48 }
 0x5c2   :  { %2010 = vpow2.f32 %v591_v49 }
 0x5c5   :  { %v588_v50 = vpop.xlane.xlu2 %587 }
 0x5c6   :  { %v590_v51 = vsub.f32 %v582_v43, %v588_v50 }
 0x5c8   :  { %v2011_v52 = vpop.eup %2010  ;;  %v593_v53 = vmul.f32 1.442695, %v590_v51 }
 0x5c9   :  { %v595_v54 = vsel %vm336_vm14, %v2011_v52, 0.0 }
 0x5ca   :  { %2012 = vpow2.f32 %v593_v53  ;;  %596 = vadd.xlane.f32.xlu0 %v595_v54 }
 0x5d0   :  { %v2013_v55 = vpop.eup %2012 }
 0x5d1   :  { %v598_v56 = vsel %vm336_vm14, %v2013_v55, 0.0 }
 0x5d2   :  { %599 = vadd.xlane.f32.xlu1 %v598_v56  ;;  %v1981_v56 = vld [vmem:[%s2495_s5 + $0x6] ss:$0 sm:$0xff] }
 0x63d   :  { %v597_v59 = vpop.xlane.xlu0 %596 }
 0x63e   :  { %2014 = vrcp.f32 %v597_v59 }
 0x644   :  { %v2015_v60 = vpop.eup %2014 }
 0x645   :  { %v603_v61 = vmul.f32 %v2015_v60, %v2011_v52  ;;  %v600_v62 = vpop.xlane.xlu1 %599  ;;  %v1980_v52 = vld [vmem:[%s2495_s5 + $0x5] ss:$0 sm:$0xff] }
 0x646   :  { %2016 = vrcp.f32 %v600_v62 }
 0x647   :  { %v605_v63 = vpack.c.bf16 %v603_v61, %v603_v61 }
 0x649   :  { %1733 = vmatmul.msk.bf16.vlgmr.msra.gmra.mxu0 %vm336_vm14, %v605_v63  ;;  %v1944_v63 = vld [vmem:[%s2493_s3 + $0x18] sm:$0xff] }
 0x64c   :  { %v2017_v0 = vpop.eup %2016 }
 0x64d   :  { %v604_v1 = vmul.f32 %v2017_v0, %v2013_v55  ;;  %v820_v0 = vsel %vm812_vm6, %v1944_v63, 0 }
 0x64e   :  { %828 = vmatpush.bf16.xpose.msrb.mxu0 %v820_v0 }
 0x64f   :  { %v606_v2 = vpack.c.bf16 %v604_v1, %v604_v1  ;;  %v1943_v1 = vld [vmem:[%s2493_s3 + $0x10] sm:$0xff] }
 0x651   :  { %1734 = vmatmul.msk.bf16.vlgmr.msra.gmra.mxu1 %vm336_vm14, %v606_v2  ;;  %v817_v2 = vsel %vm812_vm6, %v1943_v1, 0 }
 0x656   :  { %829 = vmatpush.bf16.xpose.msrb.mxu0 %v817_v2 }
 0x6c6   :  { %v622_v5 = vpop.f32.mrf.mxu0 }
 0x6ce   :  { %v624_v6 = vpop.f32.mrf.mxu0  ;;  %v641_v7 = vpop.f32.mrf.mxu1 }
 0x6cf   :  { %v645_v8 = vpack.c.bf16 %v641_v7, %v622_v5 }
 0x6d1   :  { %1747 = vmatmul.msk.bf16.vlgmr.msra.gmra.mxu2 %vm295_vm13, %v645_v8 }
 0x6d6   :  { %v643_v9 = vpop.f32.mrf.mxu1 }
 0x754   :  { %v679_v12 = vpop.f32.mrf.mxu2 }
 0x755   :  { %v684_v13 = vadd.f32 %v679_v12, %v440_v11 }
 0x757   :  { %v686_v14 = vadd.f32 %v684_v13, %v2190_v17 }
 0x759   :  { %v688_v15 = vsel %vm130_vm4, %v686_v14, 0.0 }
 0x75a   :  { %689 = vadd.xlane.f32.xlu2 %v688_v15 }
 0x75c   :  { %v681_v20 = vpop.f32.mrf.mxu2 }
 0x75d   :  { %v685_v21 = vadd.f32 %v681_v20, %v441_v16 }
 0x75f   :  { %v687_v22 = vadd.f32 %v685_v21, %v2192_v18  ;;  %v1942_v18 = vld [vmem:[%s2493_s3 + $0x8] sm:$0xff] }
 0x760   :  { %768 = vmatpush.bf16.msra.mxu3 %v1942_v18 }
 0x761   :  { %v691_v23 = vsel %vm130_vm4, %v687_v22, 0.0 }
 0x762   :  { %692 = vadd.xlane.f32.xlu0 %v691_v23 }
 0x764   :  { %769 = vmatpush.bf16.msra.mxu3 %v1941_v35 }
 0x7cd   :  { %v690_v24 = vpop.xlane.xlu2 %689 }
 0x7ce   :  { %v694_v25 = vmul.f32 %v690_v24, %v2152_v36 }
 0x7d0   :  { %v696_v26 = vsub.f32 %v686_v14, %v694_v25 }
 0x7d2   :  { %v698_v27 = vmul.f32 %v696_v26, %v696_v26 }
 0x7d4   :  { %v700_v28 = vsel %vm130_vm4, %v698_v27, 0.0 }
 0x7d5   :  { %701 = vadd.xlane.f32.xlu1 %v700_v28  ;;  %v693_v17 = vpop.xlane.xlu0 %692 }
 0x7d6   :  { %v695_v29 = vmul.f32 %v693_v17, %v2152_v36 }
 0x7d8   :  { %v697_v30 = vsub.f32 %v687_v22, %v695_v29  ;;  %v1983_v29 = vld [vmem:[%s2495_s5 + $0x8] ss:$0 sm:$0xff] }
 0x7da   :  { %v699_v31 = vmul.f32 %v697_v30, %v697_v30 }
 0x7dc   :  { %v703_v32 = vsel %vm130_vm4, %v699_v31, 0.0 }
 0x7dd   :  { %704 = vadd.xlane.f32.xlu2 %v703_v32 }
 0x848   :  { %v702_v19 = vpop.xlane.xlu1 %701 }
 0x849   :  { %v706_v33 = vmul.f32 %v702_v19, %v2152_v36 }
 0x84b   :  { %v708_v34 = vadd.f32 1e-05, %v706_v33 }
 0x84d   :  { %2018 = vrsqrt.f32 %v708_v34  ;;  %vm716_vm0 = vweird.f32 %v708_v34 }
 0x850   :  { %v705_v37 = vpop.xlane.xlu2 %704 }
 0x851   :  { %v707_v38 = vmul.f32 %v705_v37, %v2152_v36 }
 0x853   :  { %v2019_v39 = vpop.eup %2018  ;;  %v709_v40 = vadd.f32 1e-05, %v707_v38 }
 0x854   :  { %v711_v41 = vmul.f32 %v2019_v39, %v708_v34  ;;  %vm717_vm15 = vweird.f32 %v2019_v39 }
 0x855   :  { %2020 = vrsqrt.f32 %v709_v40  ;;  %vm718_vm1 = vmor %vm716_vm0, %vm717_vm15  ;;  %vm726_vm3 = vweird.f32 %v709_v40  ;;  %vm893_vm0 = vcmask 1040384  }
 0x856   :  { %v712_v42 = vmul.f32 %v2019_v39, %v711_v41 }
 0x858   :  { %v713_v43 = vmul.f32 0.5, %v712_v42 }
 0x85a   :  { %v714_v44 = vsub.f32 1.5, %v713_v43 }
 0x85b   :  { %v2021_v45 = vpop.eup %2020 }
 0x85c   :  { %v715_v46 = vmul.f32 %v2019_v39, %v714_v44  ;;  %v721_v47 = vmul.f32 %v2021_v45, %v709_v40  ;;  %vm727_vm2 = vweird.f32 %v2021_v45 }
 0x85d   :  { %vm728_vm5 = vmor %vm726_vm3, %vm727_vm2  ;;  %vm1122_vm2 = vcmask 1041409  }
 0x85e   :  { %v722_v48 = vmul.f32 %v2021_v45, %v721_v47  ;;  %v719_v49 = vsel %vm718_vm1, %v2019_v39, %v715_v46  ;;  %v1948_v47 = vld [vmem:[%s2492_s2 + $0xa8] sm:$0xff]  ;;  %vm1047_vm1 = vcmask 57344  }
 0x85f   :  { %v730_v53 = vmul.f32 %v719_v49, %v696_v26  ;;  %959 = vmatpush.bf16.msrb.mxu2 %v1948_v47 }
 0x860   :  { %v723_v50 = vmul.f32 0.5, %v722_v48  ;;  %v1950_v48 = vld [vmem:[%s2492_s2 + $0xc8] sm:$0xff] }
 0x861   :  { %v734_v57 = vmul.f32 %v1980_v52, %v730_v53  ;;  %990 = vmatpush.bf16.msrb.mxu3 %v1950_v48  ;;  %v1947_v53 = vld [vmem:[%s2492_s2 + $0xa0] sm:$0xff] }
 0x862   :  { %v724_v51 = vsub.f32 1.5, %v723_v50 }
 0x863   :  { %v738_v60 = vadd.f32 %v1981_v56, %v734_v57  ;;  %960 = vmatpush.bf16.msrb.mxu2 %v1947_v53 }
 0x864   :  { %v725_v54 = vmul.f32 %v2021_v45, %v724_v51  ;;  %v1946_v51 = vld [vmem:[%s2492_s2 + $0x88] sm:$0xff] }
 0x865   :  { %926 = vmatpush.bf16.msrb.mxu1 %v1946_v51 }
 0x866   :  { %v729_v55 = vsel %vm728_vm5, %v2021_v45, %v725_v54  ;;  %v1949_v54 = vld [vmem:[%s2492_s2 + $0xc0] sm:$0xff] }
 0x867   :  { %v731_v58 = vmul.f32 %v729_v55, %v697_v30  ;;  %991 = vmatpush.bf16.msrb.mxu3 %v1949_v54  ;;  %v1945_v55 = vld [vmem:[%s2492_s2 + $0x80] sm:$0xff] }
 0x869   :  { %v735_v59 = vmul.f32 %v1980_v52, %v731_v58  ;;  %927 = vmatpush.bf16.msrb.mxu1 %v1945_v55 }
 0x86b   :  { %v739_v61 = vadd.f32 %v1981_v56, %v735_v59 }
 0x86d   :  { %v740_v62 = vpack.c.bf16 %v739_v61, %v738_v60 }
 0x86f   :  { %1756 = vmatmul.msk.bf16.vlgmr.msra.gmra.mxu3 %vm130_vm4, %v740_v62 }
 0x8f2   :  { %v771_v4 = vpop.f32.mrf.mxu3 }
 0x8f3   :  { %v772_v5 = vadd.f32 %v1982_v3, %v771_v4 }
 0x8f5   :  { %v778_v6 = vmul.f32 0.044715, %v772_v5  ;;  %v776_v24 = vmul.f32 0.5, %v772_v5 }
 0x8f7   :  { %v780_v7 = vmul.f32 %v778_v6, %v772_v5 }
 0x8f9   :  { %v782_v8 = vmul.f32 %v780_v7, %v772_v5  ;;  %v1984_v7 = vld [vmem:[%s2495_s5 + $0x9] ss:$0 sm:$0xff] }
 0x8fa   :  { %v773_v9 = vpop.f32.mrf.mxu3 }
 0x8fb   :  { %v784_v10 = vadd.f32 %v782_v8, %v772_v5  ;;  %v774_v11 = vadd.f32 %v1982_v3, %v773_v9 }
 0x8fd   :  { %v779_v12 = vmul.f32 0.044715, %v774_v11  ;;  %v786_v13 = vmul.f32 0.7978846, %v784_v10  ;;  %v777_v25 = vmul.f32 0.5, %v774_v11 }
 0x8ff   :  { %v781_v14 = vmul.f32 %v779_v12, %v774_v11  ;;  %2022 = vtanh.f32 %v786_v13 }
 0x901   :  { %v783_v15 = vmul.f32 %v781_v14, %v774_v11 }
 0x903   :  { %v785_v16 = vadd.f32 %v783_v15, %v774_v11  ;;  %v1985_v11 = vld [vmem:[%s2495_s5 + $0xa] ss:$0 sm:$0xff] }
 0x905   :  { %v787_v20 = vmul.f32 0.7978846, %v785_v16  ;;  %v2023_v21 = vpop.eup %2022 }
 0x906   :  { %v790_v22 = vadd.f32 1.0, %v2023_v21 }
 0x907   :  { %2024 = vtanh.f32 %v787_v20 }
 0x908   :  { %v792_v27 = vmul.f32 %v790_v22, %v776_v24 }
 0x90d   :  { %v2025_v23 = vpop.eup %2024 }
 0x90e   :  { %v791_v26 = vadd.f32 1.0, %v2025_v23 }
 0x910   :  { %v793_v28 = vmul.f32 %v791_v26, %v777_v25 }
 0x912   :  { %v794_v17 = vpack.c.bf16 %v793_v28, %v792_v27  ;;  %v1986_v27 = vld [vmem:[%s2495_s5 + $0xb] ss:$0 sm:$0xff] }
 0x914   :  { %1769 = vmatmul.msk.bf16.vlgmr.msrb.gmra.mxu0 %vm812_vm6, %v794_v17 }
 0x991   :  { %v831_v30 = vpop.f32.mrf.mxu0 }
 0x992   :  { %v832_v31 = vadd.f32 %v1983_v29, %v831_v30 }
 0x994   :  { %v836_v32 = vadd.f32 %v832_v31, %v738_v60 }
 0x996   :  { %v838_v18 = vsel %vm130_vm4, %v836_v32, 0.0 }
 0x997   :  { %839 = vadd.xlane.f32.xlu0 %v838_v18 }
 0x999   :  { %v833_v19 = vpop.f32.mrf.mxu0 }
 0x99a   :  { %v834_v33 = vadd.f32 %v1983_v29, %v833_v19 }
 0x99c   :  { %v837_v34 = vadd.f32 %v834_v33, %v739_v61 }
 0x99e   :  { %v841_v35 = vsel %vm130_vm4, %v837_v34, 0.0 }
 0x99f   :  { %842 = vadd.xlane.f32.xlu1 %v841_v35 }
 0xa0a   :  { %v840_v37 = vpop.xlane.xlu0 %839 }
 0xa0b   :  { %v844_v38 = vmul.f32 %v840_v37, %v2152_v36  ;;  %v1954_v37 = vld [vmem:[%s2492_s2 + $0x98] sm:$0xff] }
 0xa0d   :  { %v846_v39 = vsub.f32 %v836_v32, %v844_v38 }
 0xa0f   :  { %v848_v40 = vmul.f32 %v846_v39, %v846_v39 }
 0xa11   :  { %v850_v41 = vsel %vm130_vm4, %v848_v40, 0.0 }
 0xa12   :  { %v843_v42 = vpop.xlane.xlu1 %842  ;;  %851 = vadd.xlane.f32.xlu2 %v850_v41  ;;  %v1953_v41 = vld [vmem:[%s2492_s2 + $0x90] sm:$0xff] }
 0xa13   :  { %v845_v43 = vmul.f32 %v843_v42, %v2152_v36 }
 0xa15   :  { %v847_v44 = vsub.f32 %v837_v34, %v845_v43 }
 0xa17   :  { %v849_v45 = vmul.f32 %v847_v44, %v847_v44 }
 0xa19   :  { %v853_v46 = vsel %vm130_vm4, %v849_v45, 0.0 }
 0xa1a   :  { %854 = vadd.xlane.f32.xlu0 %v853_v46 }
 0xa85   :  { %v852_v49 = vpop.xlane.xlu2 %851 }
 0xa86   :  { %v856_v50 = vmul.f32 %v852_v49, %v2152_v36 }
 0xa88   :  { %v858_v52 = vadd.f32 1e-05, %v856_v50 }
 0xa8a   :  { %2026 = vrsqrt.f32 %v858_v52  ;;  %vm866_vm8 = vweird.f32 %v858_v52 }
 0xa8d   :  { %v855_v56 = vpop.xlane.xlu0 %854 }
 0xa8e   :  { %v857_v57 = vmul.f32 %v855_v56, %v2152_v36 }
 0xa90   :  { %v2027_v58 = vpop.eup %2026  ;;  %v859_v59 = vadd.f32 1e-05, %v857_v57 }
 0xa91   :  { %v861_v60 = vmul.f32 %v2027_v58, %v858_v52  ;;  %vm867_vm7 = vweird.f32 %v2027_v58 }
 0xa92   :  { %2028 = vrsqrt.f32 %v859_v59  ;;  %vm868_vm9 = vmor %vm866_vm8, %vm867_vm7  ;;  %vm876_vm11 = vweird.f32 %v859_v59 }
 0xa93   :  { %v862_v61 = vmul.f32 %v2027_v58, %v861_v60 }
 0xa95   :  { %v863_v62 = vmul.f32 0.5, %v862_v61 }
 0xa97   :  { %v864_v63 = vsub.f32 1.5, %v863_v62 }
 0xa98   :  { %v2029_v0 = vpop.eup %2028 }
 0xa99   :  { %v865_v1 = vmul.f32 %v2027_v58, %v864_v63  ;;  %v871_v2 = vmul.f32 %v2029_v0, %v859_v59  ;;  %vm877_vm10 = vweird.f32 %v2029_v0  ;;  %v1956_v63 = vld [vmem:[%s2492_s2 + $0xb8] sm:$0xff] }
 0xa9a   :  { %vm878_vm15 = vmor %vm876_vm11, %vm877_vm10 }
 0xa9b   :  { %v872_v3 = vmul.f32 %v2029_v0, %v871_v2  ;;  %v869_v4 = vsel %vm868_vm9, %v2027_v58, %v865_v1  ;;  %v1958_v1 = vld [vmem:[%s2492_s2 + $0xd8] sm:$0xff]  ;;  %v1957_v2 = vld [vmem:[%s2492_s2 + $0xd0] sm:$0xff] }
 0xa9c   :  { %v880_v8 = vmul.f32 %v869_v4, %v846_v39 }
 0xa9d   :  { %v873_v5 = vmul.f32 0.5, %v872_v3 }
 0xa9e   :  { %v884_v12 = vmul.f32 %v1984_v7, %v880_v8 }
 0xa9f   :  { %v874_v6 = vsub.f32 1.5, %v873_v5 }
 0xaa0   :  { %v888_v15 = vadd.f32 %v1985_v11, %v884_v12 }
 0xaa1   :  { %v875_v9 = vmul.f32 %v2029_v0, %v874_v6 }
 0xaa3   :  { %v879_v10 = vsel %vm878_vm15, %v2029_v0, %v875_v9  ;;  %v1955_v0 = vld [vmem:[%s2492_s2 + $0xb0] sm:$0xff] }
 0xaa4   :  { %v881_v13 = vmul.f32 %v879_v10, %v847_v44 }
 0xaa6   :  { %v885_v14 = vmul.f32 %v1984_v7, %v881_v13  ;;  %v1951_v13 = vld [vmem:[%s2492_s2 + $0xe0] sm:$0xff] }
 0xaa8   :  { %v889_v16 = vadd.f32 %v1985_v11, %v885_v14  ;;  %v1952_v11 = vld [vmem:[%s2492_s2 + $0xe8] sm:$0xff]  ;;  %v1139_v14 = vsel %vm295_vm13, %v1951_v13, 0 }
 0xaa9   :  { %v1142_v12 = vsel %vm295_vm13, %v1952_v11, 0  ;;  %v1959_v11 = vld [vmem:[%s2492_s2 + $0xf0] sm:$0xff] }
 0xaaa   :  { %v891_v20 = vrot.slane %v889_v16, 7  ;;  %v2343_v21 = vpack.c.bf16 %v889_v16, %v888_v15 }
 0xaac   :  { %1795 = vmatmul.msk.bf16.vlgmr.msrb.gmra.mxu2 %vm130_vm4, %v2343_v21  ;;  %1808 = vmatmul.msk.bf16.vlgmr.msrb.gmra.mxu3 %vm130_vm4, %v2343_v21  ;;  %v2349_v22 = vsel %vm893_vm0, %v888_v15, %v891_v20 }
 0xaad   :  { %v895_v23 = vpack.c.bf16 %v2349_v22, %v2349_v22 }
 0xaaf   :  { %1782 = vmatmul.msk.bf16.vlgmr.msrb.gmra.mxu1 %vm130_vm4, %v895_v23 }
 0xb2c   :  { %v929_v24 = vpop.f32.mrf.mxu1 }
 0xb2d   :  { %v930_v31 = vadd.f32 %v1986_v27, %v929_v24 }
 0xb2f   :  { %v962_v25 = vpop.f32.mrf.mxu2  ;;  %v993_v26 = vpop.f32.mrf.mxu3  ;;  %v1001_v33 = vpack.c.bf16 %v930_v31, %v930_v31  ;;  %v999_v40 = vrot.slane %v930_v31, 1 }
 0xb30   :  { %v1003_v28 = vpack.c.bf16 %v962_v25, %v962_v25  ;;  %v1005_v17 = vpack.c.bf16 %v993_v26, %v993_v26 }
 0xb31   :  { %v1002_v42 = vpack.c.bf16 %v999_v40, %v999_v40 }
 0xb32   :  { %v1011_v29 = vsel %vm295_vm13, %v1003_v28, 0  ;;  %v1076_v30 = vsel %vm364_vm12, %v1005_v17, 0 }
 0xb33   :  { %1020 = vmatpush.bf16.xpose.msra.mxu0 %v1011_v29  ;;  %1085 = vmatpush.bf16.msra.mxu2 %v1076_v30 }
 0xb34   :  { %v931_v32 = vpop.f32.mrf.mxu1 }
 0xb35   :  { %v1987_v32 = vld [vmem:[%s2495_s5 + $0xc] ss:$0 sm:$0xff] }
 0xb37   :  { %v964_v18 = vpop.f32.mrf.mxu2  ;;  %v995_v19 = vpop.f32.mrf.mxu3  ;;  %1214 = vmatpush.bf16.msrb.mxu2 %v1956_v63 }
 0xb38   :  { %v1004_v34 = vpack.c.bf16 %v964_v18, %v964_v18  ;;  %v1006_v35 = vpack.c.bf16 %v995_v19, %v995_v19 }
 0xb3a   :  { %v1030_v38 = vsel %vm295_vm13, %v1004_v34, 0  ;;  %v1095_v39 = vsel %vm364_vm12, %v1006_v35, 0  ;;  %1809 = vmatmul.msk.bf16.vlgmr.msra.gmra.mxu0 %vm295_vm13, %v1001_v33 }
 0xb3b   :  { %1039 = vmatpush.bf16.xpose.msra.mxu1 %v1030_v38  ;;  %1104 = vmatpush.bf16.msra.mxu3 %v1095_v39 }
 0xb3c   :  { %1215 = vmatpush.bf16.msrb.mxu2 %v1955_v0  ;;  %1150 = vmatpush.bf16.xpose.msrb.mxu0 %v1142_v12  ;;  %v1392_v12 = vsel %vm295_vm13, %v1959_v11, 0 }
 0xb3f   :  { %1245 = vmatpush.bf16.msrb.mxu3 %v1958_v1  ;;  %v1960_v1 = vld [vmem:[%s2492_s2 + $0xf8] sm:$0xff] }
 0xb42   :  { %1810 = vmatmul.msk.bf16.vlgmr.msra.gmra.mxu1 %vm295_vm13, %v1002_v42 }
 0xb43   :  { %1184 = vmatpush.bf16.msrb.mxu1 %v1954_v37  ;;  %1246 = vmatpush.bf16.msrb.mxu3 %v1957_v2  ;;  %v1395_v2 = vsel %vm295_vm13, %v1960_v1, 0 }
 0xb44   :  { %1151 = vmatpush.bf16.xpose.msrb.mxu0 %v1139_v14 }
 0xb47   :  { %1185 = vmatpush.bf16.msrb.mxu1 %v1953_v41 }
 0xb52   :  { %1838 = vmatmul.msk.bf16.vlgmr.msrb.gmra.mxu1 %vm130_vm4, %v895_v23 }
 0xbb7   :  { %v1022_v43 = vpop.f32.mrf.mxu0 }
 0xbb8   :  { %v1045_v44 = vmul.f32 0.25, %v1022_v43 }
 0xbba   :  { %v1048_v45 = vsel %vm1047_vm1, %v1045_v44, -inf }
 0xbbb   :  { %1049 = vmax.xlane.f32.xlu1 %v1048_v45 }
 0xbbf   :  { %v1024_v46 = vpop.f32.mrf.mxu0  ;;  %v1041_v47 = vpop.f32.mrf.mxu1 }
 0xbc0   :  { %v1046_v48 = vmul.f32 0.25, %v1041_v47 }
 0xbc2   :  { %v1051_v49 = vsel %vm1047_vm1, %v1046_v48, -inf }
 0xbc3   :  { %1052 = vmax.xlane.f32.xlu2 %v1051_v49 }
 0xbc7   :  { %v1043_v50 = vpop.f32.mrf.mxu1 }
 0xbcf   :  { %v2372_v51 = vpop.f32.mrf.mxu1 }
 0xbd0   :  { %v1188_v33 = vadd.f32 %v1987_v32, %v2372_v51 }
 0xbd2   :  { %v1254_v39 = vrot.slane %v1188_v33, 1  ;;  %v1256_v40 = vpack.c.bf16 %v1188_v33, %v1188_v33 }
 0xbd4   :  { %v1257_v42 = vpack.c.bf16 %v1254_v39, %v1254_v39 }
 0xbd7   :  { %v1189_v52 = vpop.f32.mrf.mxu1 }
 0xc2e   :  { %v1050_v53 = vpop.xlane.xlu1 %1049 }
 0xc2f   :  { %v1054_v54 = vsub.f32 %v1045_v44, %v1050_v53 }
 0xc31   :  { %v1056_v55 = vmul.f32 1.442695, %v1054_v54 }
 0xc33   :  { %2030 = vpow2.f32 %v1056_v55 }
 0xc36   :  { %v1053_v56 = vpop.xlane.xlu2 %1052 }
 0xc37   :  { %v1055_v57 = vsub.f32 %v1046_v48, %v1053_v56 }
 0xc39   :  { %v2031_v58 = vpop.eup %2030  ;;  %v1058_v59 = vmul.f32 1.442695, %v1055_v57 }
 0xc3a   :  { %v1060_v60 = vsel %vm1047_vm1, %v2031_v58, 0.0 }
 0xc3b   :  { %2032 = vpow2.f32 %v1058_v59  ;;  %1061 = vadd.xlane.f32.xlu0 %v1060_v60 }
 0xc41   :  { %v2033_v61 = vpop.eup %2032 }
 0xc42   :  { %v1063_v62 = vsel %vm1047_vm1, %v2033_v61, 0.0 }
 0xc43   :  { %1064 = vadd.xlane.f32.xlu1 %v1063_v62 }
 0xcae   :  { %v1062_v3 = vpop.xlane.xlu0 %1061 }
 0xcaf   :  { %2034 = vrcp.f32 %v1062_v3 }
 0xcb5   :  { %v2035_v4 = vpop.eup %2034 }
 0xcb6   :  { %v1068_v5 = vmul.f32 %v2035_v4, %v2031_v58  ;;  %v1065_v6 = vpop.xlane.xlu1 %1064 }
 0xcb7   :  { %2036 = vrcp.f32 %v1065_v6 }
 0xcb8   :  { %v1070_v7 = vpack.c.bf16 %v1068_v5, %v1068_v5 }
 0xcba   :  { %1811 = vmatmul.msk.bf16.vlgmr.msra.gmra.mxu2 %vm336_vm14, %v1070_v7 }
 0xcbd   :  { %v2037_v8 = vpop.eup %2036 }
 0xcbe   :  { %v1069_v9 = vmul.f32 %v2037_v8, %v2033_v61 }
 0xcc0   :  { %v1071_v10 = vpack.c.bf16 %v1069_v9, %v1069_v9 }
 0xcc2   :  { %1812 = vmatmul.msk.bf16.vlgmr.msra.gmra.mxu3 %vm336_vm14, %v1071_v10 }
 0xcca   :  { %1851 = vmatmul.msk.bf16.vlgmr.msrb.gmra.mxu2 %vm130_vm4, %v2343_v21 }
 0xcd2   :  { %1864 = vmatmul.msk.bf16.vlgmr.msrb.gmra.mxu3 %vm130_vm4, %v2343_v21 }
 0xd3d   :  { %v1087_v15 = vpop.f32.mrf.mxu2 }
 0xd3e   :  { %v1110_v23 = vpack.c.bf16 %v1087_v15, %v1087_v15 }
 0xd40   :  { %v1119_v25 = vunpack.c.l.b16 %v1110_v23 }
 0xd45   :  { %v1089_v16 = vpop.f32.mrf.mxu2  ;;  %v1106_v20 = vpop.f32.mrf.mxu3 }
 0xd46   :  { %v1111_v24 = vpack.c.bf16 %v1106_v20, %v1106_v20 }
 0xd48   :  { %v1120_v21 = vunpack.c.l.b16 %v1111_v24 }
 0xd4a   :  { %v1121_v26 = vrot.slane %v1120_v21, 7 }
 0xd4c   :  { %v1123_v27 = vsel %vm1122_vm2, %v1121_v26, %v1119_v25 }
 0xd4d   :  { %v1124_v28 = vpack.c.b16 %v1123_v27, %v1123_v27  ;;  %v1108_v17 = vpop.f32.mrf.mxu3  ;;  %v1217_v29 = vpop.f32.mrf.mxu2 }
 0xd4e   :  { %v1258_v30 = vpack.c.bf16 %v1217_v29, %v1217_v29 }
 0xd4f   :  { %1825 = vmatmul.msk.bf16.vlgmr.msrb.gmra.mxu0 %vm295_vm13, %v1124_v28  ;;  %v1988_v28 = vld [vmem:[%s2495_s5 + $0xd] ss:$0 sm:$0xff] }
 0xd50   :  { %v1266_v31 = vsel %vm295_vm13, %v1258_v30, 0 }
 0xd51   :  { %1275 = vmatpush.bf16.xpose.msra.mxu0 %v1266_v31 }
 0xd55   :  { %v1219_v18 = vpop.f32.mrf.mxu2  ;;  %v1248_v19 = vpop.f32.mrf.mxu3 }
 0xd56   :  { %v1259_v34 = vpack.c.bf16 %v1219_v18, %v1219_v18  ;;  %v1260_v35 = vpack.c.bf16 %v1248_v19, %v1248_v19 }
 0xd58   :  { %v1285_v37 = vsel %vm295_vm13, %v1259_v34, 0  ;;  %v1330_v38 = vsel %vm364_vm12, %v1260_v35, 0 }
 0xd59   :  { %1294 = vmatpush.bf16.xpose.msra.mxu1 %v1285_v37  ;;  %1339 = vmatpush.bf16.msra.mxu2 %v1330_v38  ;;  %v1962_v38 = vld [vmem:[%s2493_s3 + $0x28] sm:$0xff] }
 0xd5a   :  { %1403 = vmatpush.bf16.xpose.msrb.mxu0 %v1395_v2 }
 0xd5d   :  { %v1250_v41 = vpop.f32.mrf.mxu3 }
 0xd5e   :  { %v1261_v43 = vpack.c.bf16 %v1250_v41, %v1250_v41 }
 0xd5f   :  { %1865 = vmatmul.msk.bf16.vlgmr.msra.gmra.mxu0 %vm295_vm13, %v1256_v40 }
 0xd60   :  { %v1349_v44 = vsel %vm364_vm12, %v1261_v43, 0  ;;  %1866 = vmatmul.msk.bf16.vlgmr.msra.gmra.mxu1 %vm295_vm13, %v1257_v42  ;;  %vm1412_vm12 = vcmask 254976  }
 0xd61   :  { %1358 = vmatpush.bf16.msra.mxu3 %v1349_v44  ;;  %1470 = vmatpush.bf16.msrb.mxu1 %v1962_v38 }
 0xd62   :  { %1404 = vmatpush.bf16.xpose.msrb.mxu0 %v1392_v12 }
 0xdcc   :  { %v1153_v45 = vpop.f32.mrf.mxu0 }
 0xdcd   :  { %v1158_v17 = vadd.f32 %v1988_v28, %v1153_v45 }
 0xdd4   :  { %v1155_v46 = vpop.f32.mrf.mxu0 }
 0xddc   :  { %v1277_v47 = vpop.f32.mrf.mxu0 }
 0xddd   :  { %v1300_v48 = vmul.f32 0.25, %v1277_v47  ;;  %v1296_v49 = vpop.f32.mrf.mxu1 }
 0xdde   :  { %v1301_v50 = vmul.f32 0.25, %v1296_v49 }
 0xddf   :  { %v1302_v51 = vsel %vm1047_vm1, %v1300_v48, -inf }
 0xde0   :  { %1303 = vmax.xlane.f32.xlu0 %v1302_v51  ;;  %v1305_v52 = vsel %vm1047_vm1, %v1301_v50, -inf }
 0xde1   :  { %1306 = vmax.xlane.f32.xlu2 %v1305_v52 }
 0xde4   :  { %v1279_v53 = vpop.f32.mrf.mxu0 }
 0xde5   :  { %v1298_v54 = vpop.f32.mrf.mxu1 }
 0xe53   :  { %v1304_v55 = vpop.xlane.xlu0 %1303 }
 0xe54   :  { %v1308_v56 = vsub.f32 %v1300_v48, %v1304_v55  ;;  %v1307_v57 = vpop.xlane.xlu2 %1306  ;;  %v1989_v48 = vld [vmem:[%s2495_s5 + $0xe] ss:$0 sm:$0xff]  ;;  %v1964_v55 = vld [vmem:[%s2493_s3 + $0x38] sm:$0xff] }
 0xe55   :  { %v1309_v58 = vsub.f32 %v1301_v50, %v1307_v57  ;;  %v1990_v50 = vld [vmem:[%s2495_s5 + $0xf] ss:$0 sm:$0xff]  ;;  %v1963_v57 = vld [vmem:[%s2493_s3 + $0x30] sm:$0xff] }
 0xe56   :  { %v1310_v59 = vmul.f32 1.442695, %v1308_v56  ;;  %v1511_v56 = vsel %vm812_vm6, %v1964_v55, 0 }
 0xe57   :  { %v1312_v60 = vmul.f32 1.442695, %v1309_v58  ;;  %1519 = vmatpush.bf16.xpose.msrb.mxu2 %v1511_v56  ;;  %v1508_v58 = vsel %vm812_vm6, %v1963_v57, 0 }
 0xe58   :  { %2038 = vpow2.f32 %v1310_v59  ;;  %v1991_v59 = vld [vmem:[%s2495_s5 + $0x10] ss:$0 sm:$0xff] }
 0xe59   :  { %2040 = vpow2.f32 %v1312_v60 }
 0xe5e   :  { %v2039_v61 = vpop.eup %2038 }
 0xe5f   :  { %v2041_v62 = vpop.eup %2040  ;;  %v1314_v63 = vsel %vm1047_vm1, %v2039_v61, 0.0  ;;  %1520 = vmatpush.bf16.xpose.msrb.mxu2 %v1508_v58 }
 0xe60   :  { %1315 = vadd.xlane.f32.xlu2 %v1314_v63  ;;  %v1317_v0 = vsel %vm1047_vm1, %v2041_v62, 0.0 }
 0xe61   :  { %1318 = vadd.xlane.f32.xlu1 %v1317_v0 }
 0xed3   :  { %v1316_v3 = vpop.xlane.xlu2 %1315 }
 0xed4   :  { %2042 = vrcp.f32 %v1316_v3  ;;  %v1319_v4 = vpop.xlane.xlu1 %1318 }
 0xed5   :  { %2044 = vrcp.f32 %v1319_v4 }
 0xeda   :  { %v2043_v5 = vpop.eup %2042 }
 0xedb   :  { %v2045_v6 = vpop.eup %2044  ;;  %v1322_v7 = vmul.f32 %v2043_v5, %v2039_v61 }
 0xedc   :  { %v1323_v8 = vmul.f32 %v2045_v6, %v2041_v62 }
 0xedd   :  { %v1324_v9 = vpack.c.bf16 %v1322_v7, %v1322_v7 }
 0xede   :  { %v1325_v10 = vpack.c.bf16 %v1323_v8, %v1323_v8 }
 0xedf   :  { %1867 = vmatmul.msk.bf16.vlgmr.msra.gmra.mxu2 %vm336_vm14, %v1324_v9  ;;  %v1992_v9 = vld [vmem:[%s2495_s5 + $0x11] ss:$0 sm:$0xff] }
 0xee0   :  { %1868 = vmatmul.msk.bf16.vlgmr.msra.gmra.mxu3 %vm336_vm14, %v1325_v10 }
 0xf62   :  { %v1341_v13 = vpop.f32.mrf.mxu2 }
 0xf63   :  { %v1360_v14 = vpop.f32.mrf.mxu3  ;;  %v1364_v15 = vpack.c.bf16 %v1341_v13, %v1341_v13 }
 0xf64   :  { %v1365_v16 = vpack.c.bf16 %v1360_v14, %v1360_v14 }
 0xf65   :  { %v1373_v23 = vunpack.c.l.b16 %v1364_v15 }
 0xf66   :  { %v1374_v20 = vunpack.c.l.b16 %v1365_v16 }
 0xf68   :  { %v1375_v24 = vrot.slane %v1374_v20, 7 }
 0xf6a   :  { %v1376_v21 = vsel %vm1122_vm2, %v1375_v24, %v1373_v23  ;;  %v1343_v25 = vpop.f32.mrf.mxu2 }
 0xf6b   :  { %v1377_v26 = vpack.c.b16 %v1376_v21, %v1376_v21  ;;  %v1362_v27 = vpop.f32.mrf.mxu3  ;;  %v1966_v21 = vld [vmem:[%s2494_s4 + $0x8] sm:$0xff]  ;;  %v1965_v25 = vld [vmem:[%s2494_s4] sm:$0xff] }
 0xf6c   :  { %1583 = vmatpush.bf16.msrb.mxu3 %v1966_v21 }
 0xf6d   :  { %1881 = vmatmul.msk.bf16.vlgmr.msrb.gmra.mxu0 %vm295_vm13, %v1377_v26 }
 0xf70   :  { %1584 = vmatpush.bf16.msrb.mxu3 %v1965_v25 }
 0xfea   :  { %v1406_v29 = vpop.f32.mrf.mxu0 }
 0xfeb   :  { %v1410_v30 = vadd.f32 %v1406_v29, %v1158_v17 }
 0xfed   :  { %v1411_v31 = vadd.f32 %v1410_v30, %v2349_v22  ;;  %v1961_v22 = vld [vmem:[%s2493_s3 + $0x20] sm:$0xff] }
 0xfee   :  { %1471 = vmatpush.bf16.msrb.mxu1 %v1961_v22  ;;  %v1995_v22 = vld [vmem:[%s2495_s5 + $0x14] ss:$0 sm:$0xff] }
 0xfef   :  { %v1413_v32 = vsel %vm1412_vm12, %v1411_v31, 0.0 }
 0xff0   :  { %1414 = vadd.xlane.f32.xlu0 %v1413_v32 }
 0xff2   :  { %v1408_v18 = vpop.f32.mrf.mxu0 }
0x1063   :  { %v1415_v19 = vpop.xlane.xlu0 %1414 }
0x1064   :  { %v1416_v33 = vmul.f32 %v1415_v19, %v2152_v36  ;;  %v1993_v19 = vld [vmem:[%s2495_s5 + $0x12] ss:$0 sm:$0xff] }
0x1066   :  { %v1417_v34 = vsub.f32 %v1411_v31, %v1416_v33 }
0x1068   :  { %v1418_v35 = vmul.f32 %v1417_v34, %v1417_v34 }
0x106a   :  { %v1419_v37 = vsel %vm1412_vm12, %v1418_v35, 0.0 }
0x106b   :  { %1420 = vadd.xlane.f32.xlu1 %v1419_v37 }
0x10de   :  { %v1421_v39 = vpop.xlane.xlu1 %1420 }
0x10df   :  { %v1422_v40 = vmul.f32 %v1421_v39, %v2152_v36 }
0x10e1   :  { %v1423_v41 = vadd.f32 1e-05, %v1422_v40 }
0x10e3   :  { %2046 = vrsqrt.f32 %v1423_v41  ;;  %vm1430_vm14 = vweird.f32 %v1423_v41 }
0x10e9   :  { %v2047_v42 = vpop.eup %2046 }
0x10ea   :  { %v1425_v43 = vmul.f32 %v2047_v42, %v1423_v41  ;;  %vm1431_vm13 = vweird.f32 %v2047_v42 }
0x10eb   :  { %vm1432_vm3 = vmor %vm1430_vm14, %vm1431_vm13 }
0x10ec   :  { %v1426_v44 = vmul.f32 %v2047_v42, %v1425_v43 }
0x10ee   :  { %v1427_v45 = vmul.f32 0.5, %v1426_v44 }
0x10f0   :  { %v1428_v46 = vsub.f32 1.5, %v1427_v45 }
0x10f2   :  { %v1429_v47 = vmul.f32 %v2047_v42, %v1428_v46 }
0x10f4   :  { %v1433_v49 = vsel %vm1432_vm3, %v2047_v42, %v1429_v47 }
0x10f5   :  { %v1434_v51 = vmul.f32 %v1433_v49, %v1417_v34 }
0x10f7   :  { %v1437_v52 = vmul.f32 %v1989_v48, %v1434_v51 }
0x10f9   :  { %v1440_v53 = vadd.f32 %v1990_v50, %v1437_v52 }
0x10fb   :  { %v1441_v54 = vpack.c.bf16 %v1440_v53, %v1440_v53 }
0x10fd   :  { %1894 = vmatmul.msk.bf16.vlgmr.msrb.gmra.mxu1 %vm130_vm4, %v1441_v54 }
0x117a   :  { %v1473_v60 = vpop.f32.mrf.mxu1 }
0x117b   :  { %v1474_v61 = vadd.f32 %v1991_v59, %v1473_v60 }
0x117d   :  { %v1478_v62 = vmul.f32 0.044715, %v1474_v61  ;;  %v1477_v5 = vmul.f32 0.5, %v1474_v61 }
0x117f   :  { %v1479_v63 = vmul.f32 %v1478_v62, %v1474_v61 }
0x1181   :  { %v1480_v0 = vmul.f32 %v1479_v63, %v1474_v61 }
0x1182   :  { %v1475_v1 = vpop.f32.mrf.mxu1 }
0x1183   :  { %v1481_v2 = vadd.f32 %v1480_v0, %v1474_v61 }
0x1185   :  { %v1482_v3 = vmul.f32 0.7978846, %v1481_v2 }
0x1187   :  { %2048 = vtanh.f32 %v1482_v3 }
0x118d   :  { %v2049_v4 = vpop.eup %2048 }
0x118e   :  { %v1484_v6 = vadd.f32 1.0, %v2049_v4 }
0x1190   :  { %v1485_v7 = vmul.f32 %v1484_v6, %v1477_v5 }
0x1192   :  { %v1486_v8 = vpack.c.bf16 %v1485_v7, %v1485_v7 }
0x1194   :  { %1907 = vmatmul.msk.bf16.vlgmr.msrb.gmra.mxu2 %vm812_vm6, %v1486_v8 }
0x1217   :  { %v1522_v10 = vpop.f32.mrf.mxu2 }
0x1218   :  { %v1523_v11 = vadd.f32 %v1992_v9, %v1522_v10 }
0x121a   :  { %v1526_v12 = vadd.f32 %v1523_v11, %v1440_v53 }
0x121c   :  { %v1527_v13 = vsel %vm1412_vm12, %v1526_v12, 0.0 }
0x121d   :  { %1528 = vadd.xlane.f32.xlu2 %v1527_v13 }
0x121f   :  { %v1524_v14 = vpop.f32.mrf.mxu2 }
0x1290   :  { %v1529_v15 = vpop.xlane.xlu2 %1528 }
0x1291   :  { %v1530_v16 = vmul.f32 %v1529_v15, %v2152_v36 }
0x1293   :  { %v1531_v20 = vsub.f32 %v1526_v12, %v1530_v16 }
0x1295   :  { %v1532_v23 = vmul.f32 %v1531_v20, %v1531_v20 }
0x1297   :  { %v1533_v24 = vsel %vm1412_vm12, %v1532_v23, 0.0 }
0x1298   :  { %1534 = vadd.xlane.f32.xlu0 %v1533_v24 }
0x130b   :  { %v1535_v26 = vpop.xlane.xlu0 %1534 }
0x130c   :  { %v1536_v27 = vmul.f32 %v1535_v26, %v2152_v36  ;;  %v1994_v36 = vld [vmem:[%s2495_s5 + $0x13] ss:$0 sm:$0xff] }
0x130e   :  { %v1537_v28 = vadd.f32 1e-05, %v1536_v27 }
0x1310   :  { %2050 = vrsqrt.f32 %v1537_v28  ;;  %vm1544_vm6 = vweird.f32 %v1537_v28 }
0x1316   :  { %v2051_v17 = vpop.eup %2050 }
0x1317   :  { %v1539_v29 = vmul.f32 %v2051_v17, %v1537_v28  ;;  %vm1545_vm5 = vweird.f32 %v2051_v17 }
0x1318   :  { %vm1546_vm7 = vmor %vm1544_vm6, %vm1545_vm5 }
0x1319   :  { %v1540_v30 = vmul.f32 %v2051_v17, %v1539_v29 }
0x131b   :  { %v1541_v31 = vmul.f32 0.5, %v1540_v30 }
0x131d   :  { %v1542_v32 = vsub.f32 1.5, %v1541_v31 }
0x131f   :  { %v1543_v18 = vmul.f32 %v2051_v17, %v1542_v32 }
0x1321   :  { %v1547_v33 = vsel %vm1546_vm7, %v2051_v17, %v1543_v18 }
0x1322   :  { %v1548_v34 = vmul.f32 %v1547_v33, %v1531_v20 }
0x1324   :  { %v1551_v35 = vmul.f32 %v1993_v19, %v1548_v34 }
0x1326   :  { %v1554_v37 = vadd.f32 %v1994_v36, %v1551_v35 }
0x1328   :  { %v1555_v38 = vpack.c.bf16 %v1554_v37, %v1554_v37 }
0x132a   :  { %1916 = vmatmul.msk.bf16.vlgmr.msrb.gmra.mxu3 %vm130_vm4, %v1555_v38 }
0x13ad   :  { %v1586_v39 = vpop.f32.mrf.mxu3 }
0x13ae   :  { %v1587_v40 = vadd.f32 %v1995_v22, %v1586_v39 }
0x13b0   :  { %2052 = vtanh.f32 %v1587_v40 }
0x13b5   :  { %v1588_v41 = vpop.f32.mrf.mxu3 }
0x13b6   :  { %v2053_v42 = vpop.eup %2052 }
0x13b7   :  { %1591 = vst.msk [vmem:[#allocation2] sm:$0x3] %vm1412_vm12, %v2053_v42 }
0x13b8   :  { %1602 = dma.vmem_to_hbm [thread:$0]  %s1598_s0, 32, %s1600_s12, [#allocation3]  }
0x13b9   :  { %2078 = dma.done.wait [#allocation3], 32  }
0x13ba   :  { %2079 = vsyncadd [#allocation3], 4294967264 }
0x13bb   :  { %1607 = vsyncpa [#allocation3], 1 }

</bundles_post_ra>
